<compile_context>
chip_gen: v7x
topology: tpu7x:2x2x1
jax: 0.10.0
libtpu: 0.0.40
codegen_flags: <defaults>
</compile_context>

<pallas_src>
import functools

import jax
import jax.numpy as jnp
from jax.experimental import pallas as pl
from jax.experimental.pallas import tpu as pltpu


def _ds(start, size, stride=1):
    if stride == 1:
        return pl.ds(start, size)
    return pl.ds(start, size, stride=stride)


def _largest_divisor_leq(n, cap):
    cap = max(1, min(n, cap))
    for d in range(cap, 0, -1):
        if n % d == 0:
            return d
    return 1


def _conv_add_relu_kernel(x_ref, w_ref, b_ref, add_ref, o_ref, *,
                          taps_groups, sh, sw, dh, dw, OW, coh):
    # x_ref:   (1, Hp, Wp, Cin)    zero-padded NHWC image, bf16 (resident over c,t)
    # w_ref:   (G, Cfold, TOC)     bf16 weights, tap-group major (resident over t)
    # b_ref:   (1, TOC)            f32 bias
    # add_ref: (1, toh, OW, Oblk)  residual tile (native dtype, unpadded channels)
    # o_ref:   (1, toh, OW, Oblk)  output tile (unpadded channels)
    t = pl.program_id(2)
    Cin = x_ref.shape[3]
    toh = o_ref.shape[1]
    Oblk = o_ref.shape[3]
    TOC = w_ref.shape[2]
    nch = toh // coh
    crows = coh * OW
    bias_row = b_ref[...]                      # (1, TOC) f32, hoisted
    row_base = t * (toh * sh)

    # Static unroll over row chunks: each chunk's f32 accumulator (crows, TOC)
    # stays vreg-resident across all tap-group matmuls (no per-tap VMEM RMW).
    for c in range(nch):
        r0 = row_base + c * (coh * sh)
        acc = jnp.broadcast_to(bias_row, (crows, TOC))      # bias-initialized acc
        for g, taps in enumerate(taps_groups):
            parts = [x_ref[0, _ds(r0 + kh * dh, coh, sh), _ds(kw * dw, OW, sw), :]
                     for (kh, kw) in taps]
            xop = parts[0] if len(parts) == 1 else jnp.concatenate(parts, axis=-1)
            xop = xop.reshape(crows, len(taps) * Cin)        # (crows, taps*Cin) bf16
            acc = acc + jnp.dot(xop, w_ref[g],
                                preferred_element_type=jnp.float32)
        res = add_ref[0, pl.ds(c * coh, coh)]                # (coh, OW, Oblk)
        res = res.reshape(crows, Oblk).astype(jnp.float32)
        y = jnp.maximum(acc[:, :Oblk] + res, 0.0)            # fused add + ReLU epilogue
        o_ref[0, pl.ds(c * coh, coh)] = (
            y.reshape(coh, OW, Oblk).astype(o_ref.dtype))


def conv2d_add_relu(inp, add_input, weight, bias, stride=1, padding=1,
                    dilation=1, groups=1):
    """Fused conv2d + residual add + relu.

    inp: [N,Cin,H,W] NCHW, weight: [O,Cin,KH,KW], add_input: [N,O,OH,OW].
    Returns relu(conv2d(inp) + bias + add_input) in NCHW.
    """
    # TODO(synk): groups > 1 (grouped conv) not implemented.
    assert groups == 1, "only groups=1 supported"
    if isinstance(stride, int):
        stride = (stride, stride)
    if isinstance(padding, int):
        padding = (padding, padding)
    if isinstance(dilation, int):
        dilation = (dilation, dilation)
    sh, sw = stride
    ph, pw = padding
    dh, dw = dilation

    N, Cin, H, W = inp.shape
    O, _, KH, KW = weight.shape
    OH = (H + 2 * ph - dh * (KH - 1) - 1) // sh + 1
    OW = (W + 2 * pw - dw * (KW - 1) - 1) // sw + 1
    assert add_input.shape == (N, O, OH, OW)
    if bias is None:
        bias = jnp.zeros((O,), jnp.float32)

    LANE = 128
    Hp, Wp = H + 2 * ph, W + 2 * pw
    Opad = -(-O // LANE) * LANE

    # ---- output-channel tiling (MXU-width sub-tiles, narrow accumulator) ----
    if Opad <= 512:
        n_oc, TOC, Oblk = 1, Opad, O
    elif O % 256 == 0:
        n_oc, TOC, Oblk = O // 256, 256, 256
    elif O % 128 == 0:
        n_oc, TOC, Oblk = O // 128, 128, 128
    else:
        n_oc, TOC, Oblk = 1, Opad, O
    Opad = n_oc * TOC

    # ---- tap folding: widen the MXU contraction when Cin is small ----
    if Cin >= 256:
        taps_groups = tuple(((kh, kw),) for kh in range(KH) for kw in range(KW))
    elif KW * Cin >= 256 or KH * KW * Cin > 512:
        taps_groups = tuple(tuple((kh, kw) for kw in range(KW)) for kh in range(KH))
    else:
        taps_groups = (tuple((kh, kw) for kh in range(KH) for kw in range(KW)),)
    G = len(taps_groups)
    Cfold = len(taps_groups[0]) * Cin

    # ---- row tiling: grid tile of toh rows, chunked in-kernel into coh rows so
    #      each chunk's f32 accumulator (coh*OW, TOC) fits the vreg budget ----
    acc_rows = max(1, (96 * 1024) // (4 * TOC))     # ~96 KiB accumulator budget
    coh_cap = max(1, acc_rows // max(OW, 1))
    toh_cap = max(1, min(1024 // max(OW, 1), 8 * coh_cap))
    toh = _largest_divisor_leq(OH, toh_cap)
    coh = _largest_divisor_leq(toh, coh_cap)
    n_row = OH // toh

    # ---- XLA-side layout glue (only the small spatial zero-pad of the input) ----
    x = jnp.pad(inp, ((0, 0), (0, 0), (ph, ph), (pw, pw)))
    x = x.transpose(0, 2, 3, 1).astype(jnp.bfloat16)               # [N,Hp,Wp,Cin]

    # weight[o,c,kh,kw] -> rows ordered (kh,kw,cin), O padded, grouped per tap group.
    w = weight.transpose(2, 3, 1, 0).reshape(KH * KW * Cin, O)
    w = jnp.pad(w, ((0, 0), (0, Opad - O))).astype(jnp.bfloat16)
    w = w.reshape(G, Cfold, Opad)

    b = jnp.pad(bias.astype(jnp.float32), (0, Opad - O)).reshape(1, Opad)

    # Residual: NCHW -> NHWC, native dtype, NO channel padding (HBM traffic = real data).
    addx = add_input.transpose(0, 2, 3, 1)
    add_isz = jnp.dtype(add_input.dtype).itemsize
    out_isz = jnp.dtype(inp.dtype).itemsize

    # ---- VMEM budget derived from actual block sizes & device capacity ----
    blk_bytes = (Hp * Wp * Cin * 2 + G * Cfold * TOC * 2 + TOC * 4
                 + toh * OW * Oblk * (add_isz + out_isz))
    need = 2 * blk_bytes + (4 << 20)                 # double buffers + temporaries
    try:
        vmem_cap = int(pltpu.get_tpu_info().vmem_capacity_bytes)
    except Exception:
        vmem_cap = 64 << 20
    vmem_limit = int(min(max(need, 32 << 20), vmem_cap))

    kernel = functools.partial(
        _conv_add_relu_kernel, taps_groups=taps_groups,
        sh=sh, sw=sw, dh=dh, dw=dw, OW=OW, coh=coh)

    flops = 2 * N * OH * OW * O * Cin * KH * KW
    bytes_accessed = (x.size * 2 + N * w.size * 2 + b.size * 4
                      + addx.size * add_isz + N * OH * OW * O * out_isz)

    grid = (N, n_oc, n_row)
    out_nhwc = pl.pallas_call(
        kernel,
        out_shape=jax.ShapeDtypeStruct((N, OH, OW, O), inp.dtype),
        grid_spec=pltpu.PrefetchScalarGridSpec(
            num_scalar_prefetch=0,
            grid=grid,
            in_specs=[
                # image: resident across channel/row tiles (one DMA per batch elem)
                pl.BlockSpec((1, Hp, Wp, Cin), lambda n, c, t: (n, 0, 0, 0)),
                # weights: resident across row tiles of a channel tile
                pl.BlockSpec((G, Cfold, TOC), lambda n, c, t: (0, 0, c)),
                pl.BlockSpec((1, TOC), lambda n, c, t: (0, c)),
                # residual tile (unpadded channels)
                pl.BlockSpec((1, toh, OW, Oblk), lambda n, c, t: (n, t, 0, c)),
            ],
            out_specs=pl.BlockSpec((1, toh, OW, Oblk), lambda n, c, t: (n, t, 0, c)),
        ),
        compiler_params=pltpu.CompilerParams(
            dimension_semantics=("parallel", "parallel", "parallel"),
            vmem_limit_bytes=vmem_limit,
        ),
        cost_estimate=pl.CostEstimate(
            flops=int(flops), transcendentals=0, bytes_accessed=int(bytes_accessed)),
    )(x, w, b, addx)

    return out_nhwc.transpose(0, 3, 1, 2)            # back to NCHW


def _reference(inp, add_input, weight, bias, stride, padding, dilation):
    # Same operand precision as the kernel: bf16 MXU operands, f32 accumulation.
    out = jax.lax.conv_general_dilated(
        inp.astype(jnp.bfloat16), weight.astype(jnp.bfloat16),
        window_strides=(stride, stride),
        padding=[(padding, padding), (padding, padding)],
        rhs_dilation=(dilation, dilation),
        dimension_numbers=("NCHW", "OIHW", "NCHW"),
        preferred_element_type=jnp.float32,
    )
    out = out + bias.reshape(1, -1, 1, 1) + add_input
    return jnp.maximum(out, 0.0).astype(inp.dtype)


if __name__ == "__main__":
    key = jax.random.PRNGKey(0)
    k1, k2, k3, k4 = jax.random.split(key, 4)

    # Small shapes consistent with the module's forward.
    N, Cin, H, W = 2, 4, 16, 16
    Cout, KH, KW = 8, 3, 3
    stride, padding, dilation, groups = 1, 1, 1, 1
    OH, OW = H, W  # stride 1, pad 1, 3x3

    inp = jax.random.normal(k1, (N, Cin, H, W), dtype=jnp.float32)
    add_input = jax.random.normal(k2, (N, Cout, OH, OW), dtype=jnp.float32)
    weight = jax.random.normal(k3, (Cout, Cin, KH, KW), dtype=jnp.float32) * 0.1
    bias = jax.random.normal(k4, (Cout,), dtype=jnp.float32) * 0.1

    fn = jax.jit(functools.partial(
        conv2d_add_relu, stride=stride, padding=padding,
        dilation=dilation, groups=groups))
    out = jax.block_until_ready(fn(inp, add_input, weight, bias))

    ref = _reference(inp, add_input, weight, bias, stride, padding, dilation)
    assert out.shape == (N, Cout, OH, OW)
    assert jnp.allclose(out, ref, atol=2e-3, rtol=2e-3), "mismatch vs reference conv"

    print("KERNEL_OK")
</pallas_src>

<mosaic_0001>
module attributes {stable_mosaic.version = 11 : i64} {
  func.func @_conv_add_relu_kernel(%arg0: i32, %arg1: i32, %arg2: i32, %arg3: memref<1x18x18x4xbf16, #tpu.memory_space<vmem>>, %arg4: memref<1x36x128xbf16, #tpu.memory_space<vmem>>, %arg5: memref<1x128xf32, #tpu.memory_space<vmem>>, %arg6: memref<1x16x16x8xf32, #tpu.memory_space<vmem>>, %arg7: memref<1x16x16x8xf32, #tpu.memory_space<vmem>>) attributes {dimension_semantics = [#tpu.dimension_semantics<parallel>, #tpu.dimension_semantics<parallel>, #tpu.dimension_semantics<parallel>], iteration_bounds = array<i64: 2, 1, 1>, scalar_prefetch = 0 : i64, scratch_operands = 0 : i64, tpu.core_type = #tpu.core_type<tc>, window_params = [{transform_indices = @transform_0, window_bounds = array<i64: 1, 18, 18, 4>}, {transform_indices = @transform_1, window_bounds = array<i64: 1, 36, 128>}, {transform_indices = @transform_2, window_bounds = array<i64: 1, 128>}, {transform_indices = @transform_3, window_bounds = array<i64: 1, 16, 16, 8>}, {transform_indices = @transform_4, window_bounds = array<i64: 1, 16, 16, 8>}]} {
    %c0 = arith.constant 0 : index
    %c0_0 = arith.constant 0 : index
    %0 = vector.load %arg5[%c0, %c0_0] : memref<1x128xf32, #tpu.memory_space<vmem>>, vector<1x128xf32>
    %c16_i32 = arith.constant 16 : i32
    %1 = arith.muli %arg2, %c16_i32 : i32
    %c0_i32 = arith.constant 0 : i32
    %2 = arith.addi %1, %c0_i32 : i32
    %3 = vector.shape_cast %0 : vector<1x128xf32> to vector<1x128xf32>
    %4 = vector.broadcast %3 : vector<1x128xf32> to vector<128x128xf32>
    %c0_i32_1 = arith.constant 0 : i32
    %5 = arith.addi %2, %c0_i32_1 : i32
    %c0_2 = arith.constant 0 : index
    %6 = arith.index_cast %5 : i32 to index
    %c0_3 = arith.constant 0 : index
    %c0_4 = arith.constant 0 : index
    %7 = vector.load %arg3[%c0_2, %6, %c0_3, %c0_4] : memref<1x18x18x4xbf16, #tpu.memory_space<vmem>>, vector<1x8x16x4xbf16>
    %8 = vector.shape_cast %7 : vector<1x8x16x4xbf16> to vector<8x16x4xbf16>
    %c0_i32_5 = arith.constant 0 : i32
    %9 = arith.addi %2, %c0_i32_5 : i32
    %c0_6 = arith.constant 0 : index
    %10 = arith.index_cast %9 : i32 to index
    %c1 = arith.constant 1 : index
    %c0_7 = arith.constant 0 : index
    %11 = vector.load %arg3[%c0_6, %10, %c1, %c0_7] : memref<1x18x18x4xbf16, #tpu.memory_space<vmem>>, vector<1x8x16x4xbf16>
    %12 = vector.shape_cast %11 : vector<1x8x16x4xbf16> to vector<8x16x4xbf16>
    %c0_i32_8 = arith.constant 0 : i32
    %13 = arith.addi %2, %c0_i32_8 : i32
    %c0_9 = arith.constant 0 : index
    %14 = arith.index_cast %13 : i32 to index
    %c2 = arith.constant 2 : index
    %c0_10 = arith.constant 0 : index
    %15 = vector.load %arg3[%c0_9, %14, %c2, %c0_10] : memref<1x18x18x4xbf16, #tpu.memory_space<vmem>>, vector<1x8x16x4xbf16>
    %16 = vector.shape_cast %15 : vector<1x8x16x4xbf16> to vector<8x16x4xbf16>
    %c1_i32 = arith.constant 1 : i32
    %17 = arith.addi %2, %c1_i32 : i32
    %c0_11 = arith.constant 0 : index
    %18 = arith.index_cast %17 : i32 to index
    %c0_12 = arith.constant 0 : index
    %c0_13 = arith.constant 0 : index
    %19 = vector.load %arg3[%c0_11, %18, %c0_12, %c0_13] : memref<1x18x18x4xbf16, #tpu.memory_space<vmem>>, vector<1x8x16x4xbf16>
    %20 = vector.shape_cast %19 : vector<1x8x16x4xbf16> to vector<8x16x4xbf16>
    %c1_i32_14 = arith.constant 1 : i32
    %21 = arith.addi %2, %c1_i32_14 : i32
    %c0_15 = arith.constant 0 : index
    %22 = arith.index_cast %21 : i32 to index
    %c1_16 = arith.constant 1 : index
    %c0_17 = arith.constant 0 : index
    %23 = vector.load %arg3[%c0_15, %22, %c1_16, %c0_17] : memref<1x18x18x4xbf16, #tpu.memory_space<vmem>>, vector<1x8x16x4xbf16>
    %24 = vector.shape_cast %23 : vector<1x8x16x4xbf16> to vector<8x16x4xbf16>
    %c1_i32_18 = arith.constant 1 : i32
    %25 = arith.addi %2, %c1_i32_18 : i32
    %c0_19 = arith.constant 0 : index
    %26 = arith.index_cast %25 : i32 to index
    %c2_20 = arith.constant 2 : index
    %c0_21 = arith.constant 0 : index
    %27 = vector.load %arg3[%c0_19, %26, %c2_20, %c0_21] : memref<1x18x18x4xbf16, #tpu.memory_space<vmem>>, vector<1x8x16x4xbf16>
    %28 = vector.shape_cast %27 : vector<1x8x16x4xbf16> to vector<8x16x4xbf16>
    %c2_i32 = arith.constant 2 : i32
    %29 = arith.addi %2, %c2_i32 : i32
    %c0_22 = arith.constant 0 : index
    %30 = arith.index_cast %29 : i32 to index
    %c0_23 = arith.constant 0 : index
    %c0_24 = arith.constant 0 : index
    %31 = vector.load %arg3[%c0_22, %30, %c0_23, %c0_24] : memref<1x18x18x4xbf16, #tpu.memory_space<vmem>>, vector<1x8x16x4xbf16>
    %32 = vector.shape_cast %31 : vector<1x8x16x4xbf16> to vector<8x16x4xbf16>
    %c2_i32_25 = arith.constant 2 : i32
    %33 = arith.addi %2, %c2_i32_25 : i32
    %c0_26 = arith.constant 0 : index
    %34 = arith.index_cast %33 : i32 to index
    %c1_27 = arith.constant 1 : index
    %c0_28 = arith.constant 0 : index
    %35 = vector.load %arg3[%c0_26, %34, %c1_27, %c0_28] : memref<1x18x18x4xbf16, #tpu.memory_space<vmem>>, vector<1x8x16x4xbf16>
    %36 = vector.shape_cast %35 : vector<1x8x16x4xbf16> to vector<8x16x4xbf16>
    %c2_i32_29 = arith.constant 2 : i32
    %37 = arith.addi %2, %c2_i32_29 : i32
    %c0_30 = arith.constant 0 : index
    %38 = arith.index_cast %37 : i32 to index
    %c2_31 = arith.constant 2 : index
    %c0_32 = arith.constant 0 : index
    %39 = vector.load %arg3[%c0_30, %38, %c2_31, %c0_32] : memref<1x18x18x4xbf16, #tpu.memory_space<vmem>>, vector<1x8x16x4xbf16>
    %40 = vector.shape_cast %39 : vector<1x8x16x4xbf16> to vector<8x16x4xbf16>
    %41 = tpu.concatenate %8, %12, %16, %20, %24, %28, %32, %36, %40 in 2 : vector<8x16x4xbf16>, vector<8x16x4xbf16>, vector<8x16x4xbf16>, vector<8x16x4xbf16>, vector<8x16x4xbf16>, vector<8x16x4xbf16>, vector<8x16x4xbf16>, vector<8x16x4xbf16>, vector<8x16x4xbf16> -> vector<8x16x36xbf16>
    %42 = vector.shape_cast %41 : vector<8x16x36xbf16> to vector<128x36xbf16>
    %c0_33 = arith.constant 0 : index
    %c0_34 = arith.constant 0 : index
    %c0_35 = arith.constant 0 : index
    %43 = vector.load %arg4[%c0_33, %c0_34, %c0_35] : memref<1x36x128xbf16, #tpu.memory_space<vmem>>, vector<1x36x128xbf16>
    %44 = vector.shape_cast %43 : vector<1x36x128xbf16> to vector<36x128xbf16>
    %cst = arith.constant dense<0.000000e+00> : vector<128x128xf32>
    %45 = tpu.matmul %42, %44, %cst {dimension_numbers = #tpu.dot_dimension_numbers<[1], [0], [0], [1], [0, 0, 1, 1], [], []>} : vector<128x36xbf16>, vector<36x128xbf16>, vector<128x128xf32> -> vector<128x128xf32>
    %46 = arith.addf %4, %45 : vector<128x128xf32>
    %c0_36 = arith.constant 0 : index
    %c0_37 = arith.constant 0 : index
    %c0_38 = arith.constant 0 : index
    %c0_39 = arith.constant 0 : index
    %47 = vector.load %arg6[%c0_36, %c0_37, %c0_38, %c0_39] : memref<1x16x16x8xf32, #tpu.memory_space<vmem>>, vector<1x8x16x8xf32>
    %48 = vector.shape_cast %47 : vector<1x8x16x8xf32> to vector<8x16x8xf32>
    %49 = vector.shape_cast %48 : vector<8x16x8xf32> to vector<128x8xf32>
    %50 = vector.extract_strided_slice %46 {offsets = [0, 0], sizes = [128, 8], strides = [1, 1]} : vector<128x128xf32> to vector<128x8xf32>
    %51 = arith.addf %50, %49 : vector<128x8xf32>
    %cst_40 = arith.constant 0.000000e+00 : f32
    %52 = vector.broadcast %cst_40 : f32 to vector<128x8xf32>
    %53 = arith.maximumf %51, %52 : vector<128x8xf32>
    %54 = vector.shape_cast %53 : vector<128x8xf32> to vector<8x16x8xf32>
    %c0_41 = arith.constant 0 : index
    %c0_42 = arith.constant 0 : index
    %c0_43 = arith.constant 0 : index
    %c0_44 = arith.constant 0 : index
    %55 = vector.load %arg7[%c0_41, %c0_42, %c0_43, %c0_44] : memref<1x16x16x8xf32, #tpu.memory_space<vmem>>, vector<1x8x16x8xf32>
    %56 = vector.shape_cast %55 : vector<1x8x16x8xf32> to vector<8x16x8xf32>
    %57 = vector.shape_cast %54 : vector<8x16x8xf32> to vector<1x8x16x8xf32>
    tpu.vector_store %arg7[%c0_41, %c0_42, %c0_43, %c0_44], %57 {strides = array<i32>} : memref<1x16x16x8xf32, #tpu.memory_space<vmem>>, vector<1x8x16x8xf32>,
    %c8_i32 = arith.constant 8 : i32
    %58 = arith.addi %1, %c8_i32 : i32
    %59 = vector.shape_cast %0 : vector<1x128xf32> to vector<1x128xf32>
    %60 = vector.broadcast %59 : vector<1x128xf32> to vector<128x128xf32>
    %c0_i32_45 = arith.constant 0 : i32
    %61 = arith.addi %58, %c0_i32_45 : i32
    %c0_46 = arith.constant 0 : index
    %62 = arith.index_cast %61 : i32 to index
    %c0_47 = arith.constant 0 : index
    %c0_48 = arith.constant 0 : index
    %63 = vector.load %arg3[%c0_46, %62, %c0_47, %c0_48] : memref<1x18x18x4xbf16, #tpu.memory_space<vmem>>, vector<1x8x16x4xbf16>
    %64 = vector.shape_cast %63 : vector<1x8x16x4xbf16> to vector<8x16x4xbf16>
    %c0_i32_49 = arith.constant 0 : i32
    %65 = arith.addi %58, %c0_i32_49 : i32
    %c0_50 = arith.constant 0 : index
    %66 = arith.index_cast %65 : i32 to index
    %c1_51 = arith.constant 1 : index
    %c0_52 = arith.constant 0 : index
    %67 = vector.load %arg3[%c0_50, %66, %c1_51, %c0_52] : memref<1x18x18x4xbf16, #tpu.memory_space<vmem>>, vector<1x8x16x4xbf16>
    %68 = vector.shape_cast %67 : vector<1x8x16x4xbf16> to vector<8x16x4xbf16>
    %c0_i32_53 = arith.constant 0 : i32
    %69 = arith.addi %58, %c0_i32_53 : i32
    %c0_54 = arith.constant 0 : index
    %70 = arith.index_cast %69 : i32 to index
    %c2_55 = arith.constant 2 : index
    %c0_56 = arith.constant 0 : index
    %71 = vector.load %arg3[%c0_54, %70, %c2_55, %c0_56] : memref<1x18x18x4xbf16, #tpu.memory_space<vmem>>, vector<1x8x16x4xbf16>
    %72 = vector.shape_cast %71 : vector<1x8x16x4xbf16> to vector<8x16x4xbf16>
    %c1_i32_57 = arith.constant 1 : i32
    %73 = arith.addi %58, %c1_i32_57 : i32
    %c0_58 = arith.constant 0 : index
    %74 = arith.index_cast %73 : i32 to index
    %c0_59 = arith.constant 0 : index
    %c0_60 = arith.constant 0 : index
    %75 = vector.load %arg3[%c0_58, %74, %c0_59, %c0_60] : memref<1x18x18x4xbf16, #tpu.memory_space<vmem>>, vector<1x8x16x4xbf16>
    %76 = vector.shape_cast %75 : vector<1x8x16x4xbf16> to vector<8x16x4xbf16>
    %c1_i32_61 = arith.constant 1 : i32
    %77 = arith.addi %58, %c1_i32_61 : i32
    %c0_62 = arith.constant 0 : index
    %78 = arith.index_cast %77 : i32 to index
    %c1_63 = arith.constant 1 : index
    %c0_64 = arith.constant 0 : index
    %79 = vector.load %arg3[%c0_62, %78, %c1_63, %c0_64] : memref<1x18x18x4xbf16, #tpu.memory_space<vmem>>, vector<1x8x16x4xbf16>
    %80 = vector.shape_cast %79 : vector<1x8x16x4xbf16> to vector<8x16x4xbf16>
    %c1_i32_65 = arith.constant 1 : i32
    %81 = arith.addi %58, %c1_i32_65 : i32
    %c0_66 = arith.constant 0 : index
    %82 = arith.index_cast %81 : i32 to index
    %c2_67 = arith.constant 2 : index
    %c0_68 = arith.constant 0 : index
    %83 = vector.load %arg3[%c0_66, %82, %c2_67, %c0_68] : memref<1x18x18x4xbf16, #tpu.memory_space<vmem>>, vector<1x8x16x4xbf16>
    %84 = vector.shape_cast %83 : vector<1x8x16x4xbf16> to vector<8x16x4xbf16>
    %c2_i32_69 = arith.constant 2 : i32
    %85 = arith.addi %58, %c2_i32_69 : i32
    %c0_70 = arith.constant 0 : index
    %86 = arith.index_cast %85 : i32 to index
    %c0_71 = arith.constant 0 : index
    %c0_72 = arith.constant 0 : index
    %87 = vector.load %arg3[%c0_70, %86, %c0_71, %c0_72] : memref<1x18x18x4xbf16, #tpu.memory_space<vmem>>, vector<1x8x16x4xbf16>
    %88 = vector.shape_cast %87 : vector<1x8x16x4xbf16> to vector<8x16x4xbf16>
    %c2_i32_73 = arith.constant 2 : i32
    %89 = arith.addi %58, %c2_i32_73 : i32
    %c0_74 = arith.constant 0 : index
    %90 = arith.index_cast %89 : i32 to index
    %c1_75 = arith.constant 1 : index
    %c0_76 = arith.constant 0 : index
    %91 = vector.load %arg3[%c0_74, %90, %c1_75, %c0_76] : memref<1x18x18x4xbf16, #tpu.memory_space<vmem>>, vector<1x8x16x4xbf16>
    %92 = vector.shape_cast %91 : vector<1x8x16x4xbf16> to vector<8x16x4xbf16>
    %c2_i32_77 = arith.constant 2 : i32
    %93 = arith.addi %58, %c2_i32_77 : i32
    %c0_78 = arith.constant 0 : index
    %94 = arith.index_cast %93 : i32 to index
    %c2_79 = arith.constant 2 : index
    %c0_80 = arith.constant 0 : index
    %95 = vector.load %arg3[%c0_78, %94, %c2_79, %c0_80] : memref<1x18x18x4xbf16, #tpu.memory_space<vmem>>, vector<1x8x16x4xbf16>
    %96 = vector.shape_cast %95 : vector<1x8x16x4xbf16> to vector<8x16x4xbf16>
    %97 = tpu.concatenate %64, %68, %72, %76, %80, %84, %88, %92, %96 in 2 : vector<8x16x4xbf16>, vector<8x16x4xbf16>, vector<8x16x4xbf16>, vector<8x16x4xbf16>, vector<8x16x4xbf16>, vector<8x16x4xbf16>, vector<8x16x4xbf16>, vector<8x16x4xbf16>, vector<8x16x4xbf16> -> vector<8x16x36xbf16>
    %98 = vector.shape_cast %97 : vector<8x16x36xbf16> to vector<128x36xbf16>
    %c0_81 = arith.constant 0 : index
    %c0_82 = arith.constant 0 : index
    %c0_83 = arith.constant 0 : index
    %99 = vector.load %arg4[%c0_81, %c0_82, %c0_83] : memref<1x36x128xbf16, #tpu.memory_space<vmem>>, vector<1x36x128xbf16>
    %100 = vector.shape_cast %99 : vector<1x36x128xbf16> to vector<36x128xbf16>
    %cst_84 = arith.constant dense<0.000000e+00> : vector<128x128xf32>
    %101 = tpu.matmul %98, %100, %cst_84 {dimension_numbers = #tpu.dot_dimension_numbers<[1], [0], [0], [1], [0, 0, 1, 1], [], []>} : vector<128x36xbf16>, vector<36x128xbf16>, vector<128x128xf32> -> vector<128x128xf32>
    %102 = arith.addf %60, %101 : vector<128x128xf32>
    %c0_85 = arith.constant 0 : index
    %c8 = arith.constant 8 : index
    %c0_86 = arith.constant 0 : index
    %c0_87 = arith.constant 0 : index
    %103 = vector.load %arg6[%c0_85, %c8, %c0_86, %c0_87] : memref<1x16x16x8xf32, #tpu.memory_space<vmem>>, vector<1x8x16x8xf32>
    %104 = vector.shape_cast %103 : vector<1x8x16x8xf32> to vector<8x16x8xf32>
    %105 = vector.shape_cast %104 : vector<8x16x8xf32> to vector<128x8xf32>
    %106 = vector.extract_strided_slice %102 {offsets = [0, 0], sizes = [128, 8], strides = [1, 1]} : vector<128x128xf32> to vector<128x8xf32>
    %107 = arith.addf %106, %105 : vector<128x8xf32>
    %cst_88 = arith.constant 0.000000e+00 : f32
    %108 = vector.broadcast %cst_88 : f32 to vector<128x8xf32>
    %109 = arith.maximumf %107, %108 : vector<128x8xf32>
    %110 = vector.shape_cast %109 : vector<128x8xf32> to vector<8x16x8xf32>
    %c0_89 = arith.constant 0 : index
    %c8_90 = arith.constant 8 : index
    %c0_91 = arith.constant 0 : index
    %c0_92 = arith.constant 0 : index
    %111 = vector.load %arg7[%c0_89, %c8_90, %c0_91, %c0_92] : memref<1x16x16x8xf32, #tpu.memory_space<vmem>>, vector<1x8x16x8xf32>
    %112 = vector.shape_cast %111 : vector<1x8x16x8xf32> to vector<8x16x8xf32>
    %113 = vector.shape_cast %110 : vector<8x16x8xf32> to vector<1x8x16x8xf32>
    tpu.vector_store %arg7[%c0_89, %c8_90, %c0_91, %c0_92], %113 {strides = array<i32>} : memref<1x16x16x8xf32, #tpu.memory_space<vmem>>, vector<1x8x16x8xf32>,
    return
  }
  func.func @transform_0(%arg0: i32, %arg1: i32, %arg2: i32) -> (i32, i32, i32, i32) {
    %c0_i32 = arith.constant 0 : i32
    %c0_i32_0 = arith.constant 0 : i32
    %c0_i32_1 = arith.constant 0 : i32
    %c0_i32_2 = arith.constant 0 : i32
    return %arg0, %c0_i32, %c0_i32_0, %c0_i32_1 : i32, i32, i32, i32
  }
  func.func @transform_1(%arg0: i32, %arg1: i32, %arg2: i32) -> (i32, i32, i32) {
    %c0_i32 = arith.constant 0 : i32
    %c0_i32_0 = arith.constant 0 : i32
    %c0_i32_1 = arith.constant 0 : i32
    return %c0_i32, %c0_i32_0, %arg1 : i32, i32, i32
  }
  func.func @transform_2(%arg0: i32, %arg1: i32, %arg2: i32) -> (i32, i32) {
    %c0_i32 = arith.constant 0 : i32
    %c0_i32_0 = arith.constant 0 : i32
    return %c0_i32, %arg1 : i32, i32
  }
  func.func @transform_3(%arg0: i32, %arg1: i32, %arg2: i32) -> (i32, i32, i32, i32) {
    %c0_i32 = arith.constant 0 : i32
    %c0_i32_0 = arith.constant 0 : i32
    return %arg0, %arg2, %c0_i32, %arg1 : i32, i32, i32, i32
  }
  func.func @transform_4(%arg0: i32, %arg1: i32, %arg2: i32) -> (i32, i32, i32, i32) {
    %c0_i32 = arith.constant 0 : i32
    %c0_i32_0 = arith.constant 0 : i32
    return %arg0, %arg2, %c0_i32, %arg1 : i32, i32, i32, i32
  }
}

</mosaic_0001>

<bundles_post_ra>
// kernel: conv2d_add_relu.1
= control target key start
LH: loop header
LB: loop body
LE: loop exit
PB: predicated region body
PF: predicated region fallthrough
CT: control target
= control target key end

     0   :  { %s3605_s15 = smov 0   ;;  %s3607_s16 = smov 0   ;;  %s4988_s0 = inlined_call_operand.vmem [shape: bf16[2,18,18,4], index: 0, kind: input, shape index: {}]   ;;  %s4989_s1 = inlined_call_operand.vmem [shape: bf16[1,36,128], index: 1, kind: input, shape index: {}]   ;;  %s4990_s2 = inlined_call_operand.vmem [shape: f32[1,128], index: 2, kind: input, shape index: {}]   ;;  %s4991_s3 = inlined_call_operand.vmem [shape: f32[2,16,16,8], index: 3, kind: input, shape index: {}]   ;;  %s4992_s4 = inlined_call_operand.vmem [shape: f32[2,16,16,8], index: 4, kind: output, shape index: {}]  }
   0x1   :  { %s3609_s17 = smov 0  }
   0x2 LB: > { %s33_s18 = sadd.s32 1, %s3566_s16  ;;  %p2928_p0 = scmp.ge.s32.totalorder %s3570_s17, 1  ;;  %s3570_s17 = sphi %s3609_s17, %s14_s17   ;;  %s3566_s16 = sphi %s3607_s16, %s4994_s16   ;;  %s3562_s15 = sphi %s3605_s15, %s4993_s15  }
   0x3   : > { %p35_p1 = scmp.ge.s32.totalorder %s33_s18, 2  ;;  %p225_p2 = scmp.lt.s32.totalorder %s3570_s17, 3 }
   0x5   : > { %s4996_s18 = smov (%p35_p1, %s33_s18), 0  ;;  %p226_p3 = pnand %p2928_p0, %p225_p2 }
   0x6   : > { %p279_p4 = scmp.lt.s32.totalorder (!%p226_p3), %s3562_s15, 1  ;;  %s3572_s23 = smov (!%p226_p3), 12   ;;  %vm636_vm0 = vcmask (!%p226_p3), 1046528   ;;  %vm499_vm1 = vsmask.f32 (!%p226_p3), 7424  ;;  %vm1362_vm2 = vcmask (!%p226_p3), 1041408  }
   0x7   : > { %229 = sbr.rel (%p226_p3) target bundleno = 615 (0x267), region = 36  ;;  %s3573_s24 = smov (!%p226_p3), 8   ;;  %vm1189_vm3 = vcmask (!%p226_p3), 31744   ;;  %vm1206_vm4 = vcmask (!%p226_p3), 64512   ;;  %vm1223_vm5 = vcmask (!%p226_p3), 97280   ;;  %vm1240_vm6 = vcmask (!%p226_p3), 130048  }
   0x8   : > { %s3574_s25 = smov (!%p226_p3), 4   ;;  %s3575_s26 = smov (!%p226_p3), 16   ;;  %vm1257_vm7 = vcmask (!%p226_p3), 162816   ;;  %vm1274_vm8 = vcmask (!%p226_p3), 195584   ;;  %vm1291_vm9 = vcmask (!%p226_p3), 228352   ;;  %vm1308_vm10 = vcmask (!%p226_p3), 261120  }
   0x9   : > { %s3576_s27 = smov (!%p226_p3), 20   ;;  %s3577_s30 = smov (!%p226_p3), 24   ;;  %vm1345_vm11 = vcmask (!%p226_p3), 293888  }
   0xa   : > { %s3578_s9 = smov (!%p226_p3), 28   ;;  %s3579_s12 = smov (!%p226_p3), 32  }
   0xe   : > { %s4998_s15 = smov (!%p279_p4, %s3562_s15), 1 }
   0xf   : > { %s3365_s19 = smul.u32 216, %s4998_s15  ;;  %s3295_s21 = sshll.u32 %s4998_s15, 8 }
  0x10   : > { %s4856_s28 = scalar_lea.vmem %s4992_s4, %s3295_s21 }
  0x11   : > { %s3629_s22 = scalar_lea.vmem %s4988_s0, %s3365_s19 }
  0x12   : > { %v2935_v0 = vld [vmem:[%s3629_s22 + $0xc] sm:$0xf]  ;;  %v3633_v1 = vld [vmem:[%s3629_s22 + $0x10] sm:$0xf]  ;;  %v332_v7 = vld [vmem:[%s3629_s22 + $0x4] sm:$0xf] }
  0x13   : > { %v3636_v2 = vcombine.low %v2935_v0, %v3633_v1  ;;  %v334_v3 = vld [vmem:[%s3629_s22 + $0x10] sm:$0xf]  ;;  %v356_v4 = vld [vmem:[%s3629_s22 + $0xc] sm:$0xe]  ;;  %v355_v10 = vld [vmem:[%s3629_s22] sm:$0xe] }
  0x14   : > { %v3641_v5 = vld [vmem:[%s3629_s22 + $0x14] ss:$0 sps:$4 sm:$0x11]   ;;  %v3016_v6 = vcombine.low %v356_v4, %v334_v3  ;;  %v331_v11 = vld [vmem:[%s3629_s22] sm:$0xf]  ;;  %v3015_v15 = vcombine.low %v355_v10, %v332_v7 }
  0x15   : > { %717 = vrot.lane.b32.xlu1 %v3636_v2, %s3572_s23  ;;  %v641_v9 = vrot.slane %v3641_v5, 1  ;;  %v760_v12 = vshll.u32 %v3636_v2, 16  ;;  %v333_v13 = vld [vmem:[%s3629_s22 + $0xc] sm:$0xf]  ;;  %v3653_v17 = vcombine.low %v331_v11, %v332_v7  ;;  %v3085_v19 = vld [vmem:[%s3629_s22 + $0x70] sm:$0xf] }
  0x16   : > { %v640_v8 = vrot.slane %v3016_v6, 1  ;;  %v3403_v14 = vld [vmem:[%s3629_s22 + $0x8] ss:$0 sps:$4 sm:$0x11]   ;;  %v3084_v18 = vld [vmem:[%s3629_s22 + $0x6c] sm:$0xf]  ;;  %v3661_v26 = vcombine.low %v333_v13, %v334_v3 }
  0x17   : > { %v3107_v20 = vld [vmem:[%s3629_s22 + $0x6c] sm:$0xe]  ;;  %v637_v21 = vrot.slane %v3015_v15, 1  ;;  %v638_v22 = vrot.slane %v3403_v14, 1  ;;  %v758_v25 = vshrl.u32 %v3636_v2, 16  ;;  %v501_v37 = vshrl.u32 %v3653_v17, 16 }
  0x18   : > { %v642_v16 = vsel %vm636_vm0, %v640_v8, %v641_v9  ;;  %v3407_v23 = vld [vmem:[%s3629_s22 + $0x74] ss:$0 sps:$4 sm:$0x11]   ;;  %v3195_v24 = vcombine.low %v3107_v20, %v3085_v19  ;;  %v3082_v27 = vld [vmem:[%s3629_s22 + $0x60] sm:$0xf]  ;;  %v503_v38 = vshll.u32 %v3653_v17, 16  ;;  %v3674_v40 = vcombine.low %v3084_v18, %v3085_v19 }
  0x19   : > { %663 = vrot.lane.b32.xlu0 %v642_v16, %s3573_s24  ;;  %v3083_v28 = vld [vmem:[%s3629_s22 + $0x64] sm:$0xf]  ;;  %v639_v29 = vsel %vm636_vm0, %v637_v21, %v638_v22  ;;  %v1855_v31 = vrot.slane %v3407_v23, 1  ;;  %v3106_v32 = vld [vmem:[%s3629_s22 + $0x60] sm:$0xe]  ;;  %v508_v39 = vshll.u32 %v3403_v14, 16 }
  0x1a   : > { %v1854_v30 = vrot.slane %v3195_v24, 1  ;;  %v3667_v33 = vcombine.low %v3082_v27, %v3083_v28  ;;  %v3114_v34 = vld [vmem:[%s3629_s22 + $0x6c] sm:$0xf]  ;;  %661 = vrot.lane.b32.xlu1 %v639_v29, %s3573_s24  ;;  %v3410_v35 = vld [vmem:[%s3629_s22 + $0x68] ss:$0 sps:$4 sm:$0x11]   ;;  %v3194_v36 = vcombine.low %v3106_v32, %v3083_v28 }
  0x1b   : > { %v3678_v42 = vld [vmem:[%s3629_s22 + $0x70] sm:$0xf]  ;;  %v1852_v46 = vrot.slane %v3410_v35, 1  ;;  %v505_v47 = vrot.slane %v503_v38, 1  ;;  %v510_v48 = vrot.slane %v508_v39, 1  ;;  %v1723_v51 = vshll.u32 %v3410_v35, 16 }
  0x1c   : > { %v1856_v41 = vsel %vm636_vm0, %v1854_v30, %v1855_v31  ;;  %v1716_v43 = vshrl.u32 %v3667_v33, 16  ;;  %v1718_v44 = vshll.u32 %v3667_v33, 16  ;;  %v1851_v45 = vrot.slane %v3194_v36, 1  ;;  %v3686_v53 = vld [vmem:[%s3629_s22 + $0x14] ss:$0 sps:$4 sm:$0x11]  }
  0x1d   : > { %1877 = vrot.lane.b32.xlu0 %v1856_v41, %s3573_s24  ;;  %v3202_v49 = vcombine.low %v3114_v34, %v3678_v42  ;;  %v513_v52 = vshrl.u32 %v3661_v26, 16  ;;  %v506_v55 = vor.u32 %v505_v47, %v501_v37  ;;  %v515_v56 = vshll.u32 %v3661_v26, 16  ;;  %v2937_v58 = vld [vmem:[%s3629_s22 + $0x18] sm:$0xf]  ;;  %v3695_v63 = vld [vmem:[%s3629_s22 + $0x1c] sm:$0xf] }
  0x1e   : > { %v1720_v50 = vrot.slane %v1718_v44, 1  ;;  %v1853_v54 = vsel %vm636_vm0, %v1851_v45, %v1852_v46  ;;  %v520_v57 = vshll.u32 %v3641_v5, 16  ;;  %v1725_v61 = vrot.slane %v1723_v51, 1  ;;  %v3704_v9 = vld [vmem:[%s3629_s22 + $0x74] ss:$0 sps:$4 sm:$0x11]  }
  0x1f   : > { %1875 = vrot.lane.b32.xlu1 %v1853_v54, %s3573_s24  ;;  %v1974_v59 = vshll.u32 %v3202_v49, 16  ;;  %v1728_v62 = vshrl.u32 %v3674_v40, 16  ;;  %v511_v0 = vsel %vm499_vm1, %v506_v55, %v510_v48  ;;  %v517_v3 = vrot.slane %v515_v56, 1  ;;  %v3116_v2 = vld [vmem:[%s3629_s22 + $0x78] sm:$0xf] }
  0x20   : > { %v1721_v60 = vor.u32 %v1720_v50, %v1716_v43  ;;  %v522_v4 = vrot.slane %v520_v57, 1  ;;  %v1730_v6 = vshll.u32 %v3674_v40, 16  ;;  %v1735_v5 = vshll.u32 %v3407_v23, 16  ;;  %v2959_v23 = vld [vmem:[%s3629_s22 + $0xc] sm:$0xe] }
  0x21   : > { %596 = vrot.lane.b32.xlu0 %v511_v0, %s3574_s25  ;;  %v762_v7 = vrot.slane %v760_v12, 1  ;;  %v765_v8 = vshll.u32 %v3686_v53, 16  ;;  %v518_v11 = vor.u32 %v517_v3, %v513_v52  ;;  %v3024_v14 = vcombine.low %v2937_v58, %v3695_v63  ;;  %v3711_v12 = vld [vmem:[%s3629_s22 + $0x7c] sm:$0xf]  ;;  %v3138_v31 = vld [vmem:[%s3629_s22 + $0x6c] sm:$0xe] }
  0x22   : > { %v1726_v10 = vsel %vm499_vm1, %v1721_v60, %v1725_v61  ;;  %v1732_v13 = vrot.slane %v1730_v6, 1  ;;  %v1737_v15 = vrot.slane %v1735_v5, 1  ;;  %v1972_v21 = vshrl.u32 %v3202_v49, 16  ;;  %v3720_v29 = vld [vmem:[%s3629_s22 + $0x20] ss:$0 sps:$4 sm:$0x11]  }
  0x23   : > { %1931 = vrot.lane.b32.xlu1 %v3202_v49, %s3572_s23  ;;  %v763_v16 = vor.u32 %v762_v7, %v758_v25  ;;  %v767_v18 = vrot.slane %v765_v8, 1  ;;  %v523_v19 = vsel %vm499_vm1, %v518_v11, %v522_v4  ;;  %v1976_v22 = vrot.slane %v1974_v59, 1  ;;  %v3728_v38 = vld [vmem:[%s3629_s22 + $0x80] ss:$0 sps:$4 sm:$0x11]  }
  0x24   : > { %v1733_v20 = vor.u32 %v1732_v13, %v1728_v62  ;;  %v772_v24 = vshll.u32 %v3024_v14, 16  ;;  %v1979_v27 = vshll.u32 %v3704_v9, 16  ;;  %v3203_v25 = vcombine.low %v3116_v2, %v3711_v12  ;;  %v2967_v46 = vld [vmem:[%s3629_s22 + $0x18] sm:$0xf]  ;;  %v3737_v47 = vld [vmem:[%s3629_s22 + $0x1c] sm:$0xf] }
  0x25   : > { %1811 = vrot.lane.b32.xlu0 %v1726_v10, %s3574_s25  ;;  %v3039_v30 = vcombine.low %v2959_v23, %v3633_v1  ;;  %v768_v32 = vsel %vm499_vm1, %v763_v16, %v767_v18  ;;  %v1977_v34 = vor.u32 %v1976_v22, %v1972_v21  ;;  %v770_v36 = vshrl.u32 %v3024_v14, 16  ;;  %v3146_v57 = vld [vmem:[%s3629_s22 + $0x78] sm:$0xf]  ;;  %v3748_v58 = vld [vmem:[%s3629_s22 + $0x7c] sm:$0xf]  ;;  %v3494_v23 = vld [vmem:[%s4989_s1] sm:$0xff]  }
  0x26   : > { %v1738_v28 = vsel %vm499_vm1, %v1733_v20, %v1737_v15  ;;  %v1981_v35 = vrot.slane %v1979_v27, 1  ;;  %v774_v37 = vrot.slane %v772_v24, 1  ;;  %v1986_v39 = vshll.u32 %v3203_v25, 16  ;;  %v3139_v60 = vld [vmem:[%s3629_s22 + $0x78] sm:$0xe]  ;;  %3319 = vmatprep.subr.bf16.mxu0 %v3494_v23 }
  0x27   : > { %598 = vrot.lane.b32.xlu1 %v523_v19, %s3574_s25  ;;  %v777_v41 = vshll.u32 %v3720_v29, 16  ;;  %v3218_v1 = vcombine.low %v3138_v31, %v3678_v42  ;;  %v893_v44 = vrot.slane %v3039_v30, 1  ;;  %v894_v45 = vrot.slane %v3686_v53, 1  ;;  %v2960_v42 = vld [vmem:[%s3629_s22 + $0x18] sm:$0xe]  ;;  %3320 = vmatpush3.bf16.msra.mxu0 %v3494_v23 }
  0x28   : > { %v1982_v43 = vsel %vm499_vm1, %v1977_v34, %v1981_v35  ;;  %v775_v48 = vor.u32 %v774_v37, %v770_v36  ;;  %v1984_v50 = vshrl.u32 %v3203_v25, 16  ;;  %v1988_v51 = vrot.slane %v1986_v39, 1  ;;  %v3758_v5 = vld [vmem:[%s3629_s22 + $0x20] ss:$0 sps:$4 sm:$0x11]   ;;  %v3497_v36 = vld [vmem:[%s4989_s1 + $0x8] sm:$0xff]  }
  0x29   : > { %1813 = vrot.lane.b32.xlu0 %v1738_v28, %s3574_s25  ;;  %v779_v49 = vrot.slane %v777_v41, 1  ;;  %v1991_v52 = vshll.u32 %v3728_v38, 16  ;;  %v3047_v54 = vcombine.low %v2967_v46, %v3737_v47  ;;  %v895_v53 = vsel %vm636_vm0, %v893_v44, %v894_v45  ;;  %v3764_v8 = vld [vmem:[%s3629_s22 + $0x28] sm:$0xf]  ;;  %v3148_v21 = vld [vmem:[%s3629_s22 + $0x84] sm:$0xf]  ;;  %3321 = vmatprep.subr.bf16.mxu0 %v3497_v36 }
  0x2a   : > { %v2107_v55 = vrot.slane %v3218_v1, 1  ;;  %v2108_v56 = vrot.slane %v3704_v9, 1  ;;  %v3040_v59 = vcombine.low %v2960_v42, %v3695_v63  ;;  %v1989_v62 = vor.u32 %v1988_v51, %v1984_v50  ;;  %v2969_v63 = vld [vmem:[%s3629_s22 + $0x24] sm:$0xf]  ;;  %v3779_v22 = vld [vmem:[%s3629_s22 + $0x88] sm:$0xf] }
  0x2b   : > { %853 = vrot.lane.b32.xlu1 %v768_v32, %s3575_s26  ;;  %v780_v61 = vsel %vm499_vm1, %v775_v48, %v779_v49  ;;  %v1993_v0 = vrot.slane %v1991_v52, 1  ;;  %v1016_v3 = vshll.u32 %v3047_v54, 16  ;;  %v3226_v4 = vcombine.low %v3146_v57, %v3748_v58  ;;  %v3772_v2 = vld [vmem:[%s3629_s22 + $0x80] ss:$0 sps:$4 sm:$0x11]   ;;  %3322 = vmatpush3.bf16.msra.mxu0 %v3497_v36 }
  0x2c   : > { %v2109_v6 = vsel %vm636_vm0, %v2107_v55, %v2108_v56  ;;  %v3219_v7 = vcombine.low %v3139_v60, %v3711_v12  ;;  %v896_v10 = vrot.slane %v3040_v59, 1  ;;  %v897_v11 = vrot.slane %v3720_v29, 1  ;;  %v2991_v28 = vld [vmem:[%s3629_s22 + $0x18] sm:$0xe]  ;;  %v3800_v41 = vld [vmem:[%s3629_s22 + $0x1c] sm:$0xf] }
  0x2d   : > { %719 = vrot.lane.b32.xlu0 %v3024_v14, %s3572_s23  ;;  %v1994_v9 = vsel %vm499_vm1, %v1989_v62, %v1993_v0  ;;  %v2230_v13 = vshll.u32 %v3226_v4, 16  ;;  %v1014_v14 = vshrl.u32 %v3047_v54, 16  ;;  %v1018_v15 = vrot.slane %v1016_v3, 1  ;;  %v3790_v34 = vld [vmem:[%s3629_s22 + $0x2c] ss:$0 sps:$4 sm:$0x11]  }
  0x2e   : > { %v1021_v16 = vshll.u32 %v3758_v5, 16  ;;  %v3048_v18 = vcombine.low %v2969_v63, %v3764_v8  ;;  %v2110_v12 = vrot.slane %v3219_v7, 1  ;;  %v898_v19 = vsel %vm636_vm0, %v896_v10, %v897_v11  ;;  %v335_v39 = vld [vmem:[%s3629_s22 + $0x18] sm:$0xf]  ;;  %v3498_v50 = vld [vmem:[%s4989_s1] sm:$0xff]   ;;  %v3502_v55 = vld [vmem:[%s4989_s1 + $0x8] sm:$0xff]  }
  0x2f   : > { %2067 = vrot.lane.b32.xlu1 %v1982_v43, %s3575_s26  ;;  %v2111_v20 = vrot.slane %v3728_v38, 1  ;;  %v2228_v24 = vshrl.u32 %v3226_v4, 16  ;;  %v2232_v27 = vrot.slane %v2230_v13, 1  ;;  %v2235_v31 = vshll.u32 %v3772_v2, 16  ;;  %v3170_v1 = vld [vmem:[%s3629_s22 + $0x78] sm:$0xe]  ;;  %3341 = vmatprep.subr.bf16.mxu1 %v3498_v50 }
  0x30   : > { %v1023_v29 = vrot.slane %v1021_v16, 1  ;;  %v1028_v30 = vshll.u32 %v3048_v18, 16  ;;  %v3227_v32 = vcombine.low %v3148_v21, %v3779_v22  ;;  %v3063_v37 = vcombine.low %v2991_v28, %v3737_v47  ;;  %v3807_v49 = vld [vmem:[%s3629_s22 + $0x8c] ss:$0 sps:$4 sm:$0x11]   ;;  %3342 = vmatpush3.bf16.msra.mxu1 %v3498_v50 }
  0x31   : > { %1933 = vrot.lane.b32.xlu0 %v3203_v25, %s3572_s23  ;;  %v1019_v25 = vor.u32 %v1018_v15, %v1014_v14  ;;  %v2112_v35 = vsel %vm636_vm0, %v2110_v12, %v2111_v20  ;;  %v2233_v38 = vor.u32 %v2232_v27, %v2228_v24  ;;  %v2237_v44 = vrot.slane %v2235_v31, 1  ;;  %v3086_v52 = vld [vmem:[%s3629_s22 + $0x78] sm:$0xf]  ;;  %v3817_v42 = vld [vmem:[%s3629_s22 + $0x7c] sm:$0xf]  ;;  %3343 = vmatprep.subr.bf16.mxu1 %v3502_v55 }
  0x32   : > { %v1026_v45 = vshrl.u32 %v3048_v18, 16  ;;  %v1030_v46 = vrot.slane %v1028_v30, 1  ;;  %v2242_v48 = vshll.u32 %v3227_v32, 16  ;;  %v1033_v47 = vshll.u32 %v3790_v34, 16  ;;  %v337_v63 = vld [vmem:[%s3629_s22 + $0x24] sm:$0xf] }
  0x33   : > { %917 = vrot.lane.b32.xlu1 %v895_v53, %s3576_s27  ;;  %v1024_v43 = vsel %vm499_vm1, %v1019_v25, %v1023_v29  ;;  %v3813_v51 = vcombine.low %v335_v39, %v3800_v41  ;;  %v1149_v53 = vrot.slane %v3063_v37, 1  ;;  %v2238_v56 = vsel %vm499_vm1, %v2233_v38, %v2237_v44  ;;  %v3846_v14 = vld [vmem:[%s3629_s22 + $0x80] ss:$0 sps:$4 sm:$0x11]   ;;  %v3088_v23 = vld [vmem:[%s3629_s22 + $0x84] sm:$0xf] }
  0x34   : > { %v1150_v57 = vrot.slane %v3758_v5, 1  ;;  %v1031_v59 = vor.u32 %v1030_v46, %v1026_v45  ;;  %v2240_v60 = vshrl.u32 %v3227_v32, 16  ;;  %v2244_v62 = vrot.slane %v2242_v48, 1  ;;  %3344 = vmatpush3.bf16.msra.mxu1 %v3502_v55  ;;  %v3860_v24 = vld [vmem:[%s3629_s22 + $0x88] sm:$0xf] }
  0x35   : > { %855 = vrot.lane.b32.xlu0 %v780_v61, %s3575_s26  ;;  %v1035_v61 = vrot.slane %v1033_v47, 1  ;;  %v2247_v0 = vshll.u32 %v3807_v49, 16  ;;  %v3830_v3 = vcombine.low %v3086_v52, %v3817_v42  ;;  %v527_v5 = vshll.u32 %v3813_v51, 16  ;;  %v3870_v37 = vld [vmem:[%s3629_s22 + $0x2c] ss:$0 sps:$4 sm:$0x11]  }
  0x36   : > { %v1151_v11 = vsel %vm636_vm0, %v1149_v53, %v1150_v57  ;;  %v2364_v13 = vrot.slane %v3772_v2, 1  ;;  %v2245_v16 = vor.u32 %v2244_v62, %v2240_v60  ;;  %v1153_v25 = vrot.slane %v3790_v34, 1  ;;  %v3108_v46 = vld [vmem:[%s3629_s22 + $0x78] sm:$0xe]  ;;  %v3895_v60 = vld [vmem:[%s3629_s22 + $0x28] sm:$0xf] }
  0x37   : > { %2131 = vrot.lane.b32.xlu1 %v2109_v6, %s3576_s27  ;;  %v3834_v6 = vld [vmem:[%s3629_s22 + $0x20] ss:$0 sps:$4 sm:$0x11]   ;;  %v1036_v15 = vsel %vm499_vm1, %v1031_v59, %v1035_v61  ;;  %v1742_v12 = vshll.u32 %v3830_v3, 16  ;;  %v1747_v29 = vshll.u32 %v3846_v14, 16  ;;  %v3874_v34 = vcombine.low %v3088_v23, %v3860_v24 }
  0x38   : > { %v532_v20 = vshll.u32 %v3834_v6, 16  ;;  %v3884_v50 = vld [vmem:[%s3629_s22 + $0x8c] ss:$0 sps:$4 sm:$0x11]   ;;  %v544_v53 = vshll.u32 %v3870_v37, 16  ;;  %v3196_v57 = vcombine.low %v3108_v46, %v3817_v42  ;;  %v647_v23 = vrot.slane %v3870_v37, 1 }
  0x39   : > { %2069 = vrot.lane.b32.xlu0 %v1994_v9, %s3575_s26  ;;  %v3840_v9 = vld [vmem:[%s3629_s22 + $0x28] sm:$0xf]  ;;  %v1744_v31 = vrot.slane %v1742_v12, 1  ;;  %v1749_v44 = vrot.slane %v1747_v29, 1  ;;  %v2939_v59 = vld [vmem:[%s3629_s22 + $0x24] sm:$0xf] }
  0x3a   : > { %v3854_v2 = vcombine.low %v337_v63, %v3840_v9  ;;  %v534_v36 = vrot.slane %v532_v20, 1  ;;  %v1759_v61 = vshll.u32 %v3884_v50, 16  ;;  %v358_v42 = vld [vmem:[%s3629_s22 + $0x24] sm:$0xe]  ;;  %v3906_v63 = vld [vmem:[%s3629_s22 + $0x88] sm:$0xf] }
  0x3b   : > { %973 = vrot.lane.b32.xlu1 %v3047_v54, %s3577_s30  ;;  %v3242_v54 = vcombine.low %v3170_v1, %v3748_v58  ;;  %v2992_v58 = vld [vmem:[%s3629_s22 + $0x24] sm:$0xe]  ;;  %v3018_v12 = vcombine.low %v358_v42, %v3840_v9  ;;  %v2971_v42 = vld [vmem:[%s3629_s22 + $0x30] sm:$0xf] }
  0x3c   : > { %v3064_v10 = vcombine.low %v2992_v58, %v3764_v8  ;;  %v529_v8 = vrot.slane %v527_v5, 1  ;;  %v539_v38 = vshll.u32 %v3854_v2, 16  ;;  %v537_v47 = vshrl.u32 %v3854_v2, 16  ;;  %v3109_v20 = vld [vmem:[%s3629_s22 + $0x84] sm:$0xe] }
  0x3d   : > { %919 = vrot.lane.b32.xlu0 %v898_v19, %s3576_s27  ;;  %v2363_v7 = vrot.slane %v3242_v54, 1  ;;  %v525_v19 = vshrl.u32 %v3813_v51, 16  ;;  %v646_v9 = vrot.slane %v3018_v12, 1 }
  0x3e   : > { %v1152_v28 = vrot.slane %v3064_v10, 1  ;;  %v541_v54 = vrot.slane %v539_v38, 1 }
  0x3f   : > { %2187 = vrot.lane.b32.xlu1 %v3226_v4, %s3577_s30  ;;  %v3171_v4 = vld [vmem:[%s3629_s22 + $0x84] sm:$0xe]  ;;  %v2365_v27 = vsel %vm636_vm0, %v2363_v7, %v2364_v13  ;;  %v1858_v13 = vrot.slane %v3846_v14, 1  ;;  %v3918_v14 = vld [vmem:[%s3629_s22 + $0x2c] ss:$0 sps:$4 sm:$0x11]  }
  0x40   : > { %v3243_v21 = vcombine.low %v3171_v4, %v3779_v22  ;;  %v1740_v22 = vshrl.u32 %v3830_v3, 16  ;;  %v1154_v1 = vsel %vm636_vm0, %v1152_v28, %v1153_v25  ;;  %v542_v62 = vor.u32 %v541_v54, %v537_v47  ;;  %v3118_v7 = vld [vmem:[%s3629_s22 + $0x84] sm:$0xf] }
  0x41   : > { %2133 = vrot.lane.b32.xlu0 %v2112_v35, %s3576_s27  ;;  %v530_v35 = vor.u32 %v529_v8, %v525_v19  ;;  %v1752_v4 = vshrl.u32 %v3874_v34, 16  ;;  %v3204_v19 = vcombine.low %v3118_v7, %v3906_v63  ;;  %v3197_v25 = vcombine.low %v3109_v20, %v3860_v24  ;;  %v3965_v7 = vld [vmem:[%s3629_s22 + $0x34] sm:$0xf]  ;;  %v3150_v20 = vld [vmem:[%s3629_s22 + $0x90] sm:$0xf] }
  0x42   : > { %v2366_v39 = vrot.slane %v3243_v21, 1  ;;  %v1745_v48 = vor.u32 %v1744_v31, %v1740_v22  ;;  %v2941_v22 = vld [vmem:[%s3629_s22 + $0x30] sm:$0xf]  ;;  %v3927_v31 = vld [vmem:[%s3629_s22 + $0x34] sm:$0xf]  ;;  %v1861_v24 = vrot.slane %v3884_v50, 1 }
  0x43   : > { %1109 = vrot.lane.b32.xlu1 %v1024_v43, %s3578_s9  ;;  %v2367_v43 = vrot.slane %v3807_v49, 1  ;;  %v535_v52 = vsel %vm499_vm1, %v530_v35, %v534_v36  ;;  %v1754_v49 = vshll.u32 %v3874_v34, 16  ;;  %v1998_v28 = vshll.u32 %v3204_v19, 16  ;;  %v3931_v35 = vld [vmem:[%s3629_s22 + $0x8c] ss:$0 sps:$4 sm:$0x11]  }
  0x44   : > { %v1750_v58 = vsel %vm499_vm1, %v1745_v48, %v1749_v44  ;;  %v648_v36 = vsel %vm636_vm0, %v646_v9, %v647_v23  ;;  %v1860_v37 = vrot.slane %v3197_v25, 1  ;;  %v3026_v38 = vcombine.low %v2941_v22, %v3927_v31  ;;  %v3941_v44 = vld [vmem:[%s3629_s22 + $0x94] sm:$0xf]  ;;  %v3141_v23 = vld [vmem:[%s3629_s22 + $0x90] sm:$0xe] }
  0x45   : > { %975 = vrot.lane.b32.xlu0 %v3048_v18, %s3577_s30  ;;  %v2249_v18 = vrot.slane %v2247_v0, 1  ;;  %v546_v0 = vrot.slane %v544_v53, 1  ;;  %v1756_v5 = vrot.slane %v1754_v49, 1  ;;  %v1996_v46 = vshrl.u32 %v3204_v19, 16 }
  0x46   : > { %v2000_v48 = vrot.slane %v1998_v28, 1  ;;  %v2003_v47 = vshll.u32 %v3931_v35, 16  ;;  %v1862_v50 = vsel %vm636_vm0, %v1860_v37, %v1861_v24  ;;  %v3948_v53 = vld [vmem:[%s3629_s22 + $0x38] ss:$0 sps:$4 sm:$0x11]  }
  0x47   : > { %2323 = vrot.lane.b32.xlu1 %v2238_v56, %s3578_s9  ;;  %v2250_v30 = vsel %vm499_vm1, %v2245_v16, %v2249_v18  ;;  %v644_v56 = vrot.slane %v3834_v6, 1  ;;  %v3025_v6 = vcombine.low %v2939_v59, %v3895_v60  ;;  %v547_v16 = vsel %vm499_vm1, %v542_v62, %v546_v0  ;;  %v3957_v0 = vld [vmem:[%s3629_s22 + $0x98] ss:$0 sps:$4 sm:$0x11]  }
  0x48   : > { %v1757_v18 = vor.u32 %v1756_v5, %v1752_v4  ;;  %v794_v59 = vshrl.u32 %v3026_v38, 16  ;;  %v801_v62 = vshll.u32 %v3948_v53, 16  ;;  %v900_v4 = vrot.slane %v3918_v14, 1 }
  0x49   : > { %2189 = vrot.lane.b32.xlu0 %v3227_v32, %s3577_s30  ;;  %v357_v32 = vld [vmem:[%s3629_s22 + $0x18] sm:$0xe]  ;;  %v784_v8 = vshll.u32 %v3025_v6, 16  ;;  %v782_v29 = vshrl.u32 %v3025_v6, 16  ;;  %v903_v24 = vrot.slane %v3948_v53, 1 }
  0x4a   : > { %v3017_v45 = vcombine.low %v357_v32, %v3800_v41  ;;  %v2368_v41 = vsel %vm636_vm0, %v2366_v39, %v2367_v43  ;;  %v789_v32 = vshll.u32 %v3918_v14, 16  ;;  %v2961_v39 = vld [vmem:[%s3629_s22 + $0x24] sm:$0xe]  ;;  %v3120_v43 = vld [vmem:[%s3629_s22 + $0x90] sm:$0xf] }
  0x4b   : > { %1173 = vrot.lane.b32.xlu1 %v1151_v11, %s3579_s12  ;;  %v1857_v11 = vrot.slane %v3196_v57, 1  ;;  %v3205_v54 = vcombine.low %v3120_v43, %v3941_v44  ;;  %v3041_v49 = vcombine.low %v2961_v39, %v3895_v60  ;;  %v3140_v57 = vld [vmem:[%s3629_s22 + $0x84] sm:$0xe] }
  0x4c   : > { %v643_v55 = vrot.slane %v3017_v45, 1  ;;  %v791_v45 = vrot.slane %v789_v32, 1  ;;  %v3220_v5 = vcombine.low %v3140_v57, %v3906_v63  ;;  %v3049_v63 = vcombine.low %v2971_v42, %v3965_v7 }
  0x4d   : > { %1111 = vrot.lane.b32.xlu0 %v1036_v15, %s3578_s9  ;;  %v1761_v15 = vrot.slane %v1759_v61, 1  ;;  %v1859_v21 = vsel %vm636_vm0, %v1857_v11, %v1858_v13  ;;  %v899_v60 = vrot.slane %v3041_v49, 1  ;;  %v803_v13 = vrot.slane %v801_v62, 1  ;;  %v3172_v62 = vld [vmem:[%s3629_s22 + $0x90] sm:$0xe] }
  0x4e   : > { %v645_v10 = vsel %vm636_vm0, %v643_v55, %v644_v56  ;;  %v2001_v55 = vor.u32 %v2000_v48, %v1996_v46  ;;  %v2005_v56 = vrot.slane %v2003_v47, 1  ;;  %v1040_v25 = vshll.u32 %v3049_v63, 16  ;;  %v3152_v48 = vld [vmem:[%s3629_s22 + $0x9c] sm:$0xf] }
  0x4f   : > { %2387 = vrot.lane.b32.xlu1 %v2365_v27, %s3579_s12  ;;  %v1762_v27 = vsel %vm499_vm1, %v1757_v18, %v1761_v15  ;;  %v2962_v18 = vld [vmem:[%s3629_s22 + $0x30] sm:$0xe]  ;;  %v901_v12 = vsel %vm636_vm0, %v899_v60, %v900_v4  ;;  %v3221_v32 = vcombine.low %v3141_v23, %v3941_v44 }
  0x50   : > { %v3042_v14 = vcombine.low %v2962_v18, %v3927_v31  ;;  %v2973_v31 = vld [vmem:[%s3629_s22 + $0x3c] sm:$0xf]  ;;  %v1042_v39 = vrot.slane %v1040_v25, 1  ;;  %v4035_v18 = vld [vmem:[%s3629_s22 + $0xa4] ss:$0 sps:$4 sm:$0x11]  }
  0x51   : > { %2325 = vrot.lane.b32.xlu0 %v2250_v30, %s3578_s9  ;;  %v786_v30 = vrot.slane %v784_v8, 1  ;;  %v2114_v8 = vrot.slane %v3931_v35, 1  ;;  %v3992_v35 = vld [vmem:[%s3629_s22 + $0x40] sm:$0xf]  ;;  %v2116_v46 = vrot.slane %v3221_v32, 1 }
  0x52   : > { %v902_v37 = vrot.slane %v3042_v14, 1  ;;  %v3050_v44 = vcombine.low %v2973_v31, %v3992_v35 }
  0x53   : > { %1175 = vrot.lane.b32.xlu1 %v1154_v1, %s3579_s12  ;;  %v787_v1 = vor.u32 %v786_v30, %v782_v29  ;;  %v3984_v29 = vld [vmem:[%s3629_s22 + $0x38] ss:$0 sps:$4 sm:$0x11]  }
  0x54   : > { %v904_v47 = vsel %vm636_vm0, %v902_v37, %v903_v24  ;;  %v1050_v60 = vshrl.u32 %v3050_v44, 16  ;;  %v4061_v37 = vld [vmem:[%s3629_s22 + $0x38] ss:$0 sps:$4 sm:$0x11]  }
  0x55   : > { %600 = vrot.lane.b32.xlu0 %v535_v52, %s3574_s25  ;;  %v796_v52 = vshll.u32 %v3026_v38, 16 }
  0x57   : > { %2389 = vrot.lane.b32.xlu1 %v2368_v41, %s3579_s12  ;;  %v792_v41 = vsel %vm499_vm1, %v787_v1, %v791_v45  ;;  %v798_v61 = vrot.slane %v796_v52, 1  ;;  %v1045_v1 = vshll.u32 %v3984_v29, 16  ;;  %v4000_v45 = vld [vmem:[%s3629_s22 + $0x98] ss:$0 sps:$4 sm:$0x11]  }
  0x58   : > { %v4007_v52 = vld [vmem:[%s3629_s22 + $0xa0] sm:$0xf] }
  0x59   : > { %1815 = vrot.lane.b32.xlu0 %v1750_v58, %s3574_s25  ;;  %v2010_v58 = vshll.u32 %v3205_v54, 16  ;;  %v799_v11 = vor.u32 %v798_v61, %v794_v59  ;;  %v1047_v49 = vrot.slane %v1045_v1, 1  ;;  %v2259_v59 = vshll.u32 %v4000_v45, 16  ;;  %v4018_v61 = vld [vmem:[%s3629_s22 + $0x44] ss:$0 sps:$4 sm:$0x11]  }
  0x5a   : > { %v3173_v1 = vld [vmem:[%s3629_s22 + $0x9c] sm:$0xe] }
  0x5b   : > { %665 = vrot.lane.b32.xlu1 %v645_v10, %s3573_s24  ;;  %v2008_v10 = vshrl.u32 %v3205_v54, 16  ;;  %v2012_v15 = vrot.slane %v2010_v58, 1  ;;  %v3229_v58 = vcombine.low %v3152_v48, %v4007_v52 }
  0x5d   : > { %602 = vrot.lane.b32.xlu0 %v547_v16, %s3574_s25  ;;  %v2015_v16 = vshll.u32 %v3957_v0, 16  ;;  %v2013_v9 = vor.u32 %v2012_v15, %v2008_v10  ;;  %v339_v10 = vld [vmem:[%s3629_s22 + $0x30] sm:$0xf]  ;;  %v2261_v15 = vrot.slane %v2259_v59, 1  ;;  %v2264_v32 = vshrl.u32 %v3229_v58, 16 }
  0x5e   : > { %v3245_v59 = vcombine.low %v3173_v1, %v4007_v52 }
  0x5f   : > { %1879 = vrot.lane.b32.xlu1 %v1859_v21, %s3573_s24  ;;  %v3977_v21 = vld [vmem:[%s3629_s22 + $0x94] sm:$0xf]  ;;  %v2017_v28 = vrot.slane %v2015_v16, 1 }
  0x60   : > { %v3228_v22 = vcombine.low %v3150_v20, %v3977_v21  ;;  %v4046_v20 = vld [vmem:[%s3629_s22 + $0x94] sm:$0xf]  ;;  %v3244_v14 = vcombine.low %v3172_v62, %v3977_v21 }
  0x61   : > { %1817 = vrot.lane.b32.xlu0 %v1762_v27, %s3574_s25  ;;  %v804_v27 = vsel %vm499_vm1, %v799_v11, %v803_v13  ;;  %v4032_v11 = vld [vmem:[%s3629_s22 + $0x34] sm:$0xf] }
  0x62   : > { %v2254_v43 = vshll.u32 %v3228_v22, 16 }
  0x63   : > { %721 = vrot.lane.b32.xlu1 %v3025_v6, %s3572_s23  ;;  %v2006_v6 = vsel %vm499_vm1, %v2001_v55, %v2005_v56  ;;  %v1052_v55 = vshll.u32 %v3050_v44, 16  ;;  %v2252_v56 = vshrl.u32 %v3228_v22, 16 }
  0x64   : > { %v2256_v57 = vrot.slane %v2254_v43, 1 }
  0x65   : > { %667 = vrot.lane.b32.xlu0 %v648_v36, %s3573_s24  ;;  %v2018_v36 = vsel %vm499_vm1, %v2013_v9, %v2017_v28  ;;  %v1054_v16 = vrot.slane %v1052_v55, 1  ;;  %v1156_v28 = vrot.slane %v3984_v29, 1  ;;  %v556_v55 = vshll.u32 %v4061_v37, 16 }
  0x66   : > { %v2257_v13 = vor.u32 %v2256_v57, %v2252_v56  ;;  %v3092_v56 = vld [vmem:[%s3629_s22 + $0x9c] sm:$0xf]  ;;  %v4089_v57 = vld [vmem:[%s3629_s22 + $0xa0] sm:$0xf] }
  0x67   : > { %1935 = vrot.lane.b32.xlu1 %v3204_v19, %s3572_s23  ;;  %v2113_v19 = vrot.slane %v3220_v5, 1  ;;  %v3506_v5 = vld [vmem:[%s4989_s1 + $0x10] ss:$0 sps:$4 sm:$0x33]   ;;  %v1055_v25 = vor.u32 %v1054_v16, %v1050_v60  ;;  %v1159_v60 = vrot.slane %v4018_v61, 1  ;;  %v558_v16 = vrot.slane %v556_v55, 1 }
  0x68   : > { %3364 = vmatprep.subr.msk.bf16.mxu1 %vm1362_vm2, %v3506_v5  ;;  %v2262_v9 = vsel %vm499_vm1, %v2257_v13, %v2261_v15  ;;  %v4102_v13 = vld [vmem:[%s3629_s22 + $0x44] ss:$0 sps:$4 sm:$0x11]   ;;  %v360_v55 = vld [vmem:[%s3629_s22 + $0x3c] sm:$0xe] }
  0x69   : > { %1881 = vrot.lane.b32.xlu0 %v1862_v50, %s3573_s24  ;;  %v2115_v30 = vsel %vm636_vm0, %v2113_v19, %v2114_v8  ;;  %v2117_v50 = vrot.slane %v3957_v0, 1  ;;  %v4042_v19 = vcombine.low %v339_v10, %v4032_v11  ;;  %v3090_v8 = vld [vmem:[%s3629_s22 + $0x90] sm:$0xf] }
  0x6a   : > { %v4056_v21 = vcombine.low %v3090_v8, %v4046_v20  ;;  %v2372_v8 = vrot.slane %v3245_v59, 1 }
  0x6b   : > { %857 = vrot.lane.b32.xlu1 %v792_v41, %s3575_s26  ;;  %v2993_v41 = vld [vmem:[%s3629_s22 + $0x30] sm:$0xe]  ;;  %v2118_v0 = vsel %vm636_vm0, %v2116_v46, %v2117_v50  ;;  %v551_v24 = vshll.u32 %v4042_v19, 16  ;;  %v2370_v46 = vrot.slane %v4000_v45, 1 }
  0x6d   : > { %723 = vrot.lane.b32.xlu0 %v3026_v38, %s3572_s23  ;;  %v1038_v38 = vshrl.u32 %v3049_v63, 16 }
  0x6f   : > { %2071 = vrot.lane.b32.xlu1 %v2006_v6, %s3575_s26  ;;  %v1043_v53 = vor.u32 %v1042_v39, %v1038_v38  ;;  %v3065_v6 = vcombine.low %v2993_v41, %v3965_v7  ;;  %v2568_v7 = vsel %vm1362_vm2, %v3506_v5, 0  ;;  %v341_v38 = vld [vmem:[%s3629_s22 + $0x3c] sm:$0xf]  ;;  %v4068_v39 = vld [vmem:[%s3629_s22 + $0x40] sm:$0xf]  ;;  %v553_v41 = vrot.slane %v551_v24, 1 }
  0x70   : > { %3346 = vmatpush3.bf16.msra.mxu1 %v2568_v7  ;;  %v4084_v45 = vcombine.low %v341_v38, %v4068_v39 }
  0x71   : > { %1937 = vrot.lane.b32.xlu0 %v3205_v54, %s3572_s23  ;;  %v3501_v54 = vld [vmem:[%s4989_s1 + $0x10] ss:$0 sps:$4 sm:$0x33]   ;;  %v1048_v42 = vsel %vm499_vm1, %v1043_v53, %v1047_v49  ;;  %v1155_v23 = vrot.slane %v3065_v6, 1  ;;  %v1766_v53 = vshll.u32 %v4056_v21, 16  ;;  %v549_v49 = vshrl.u32 %v4042_v19, 16 }
  0x72   : > { %3363 = vmatprep.subr.msk.bf16.mxu0 %vm1362_vm2, %v3501_v54  ;;  %v1364_v4 = vsel %vm1362_vm2, %v3501_v54, 0  ;;  %v4078_v54 = vld [vmem:[%s3629_s22 + $0x98] ss:$0 sps:$4 sm:$0x11]   ;;  %v1764_v6 = vshrl.u32 %v4056_v21, 16  ;;  %v563_v7 = vshll.u32 %v4084_v45, 16 }
  0x73   : > { %921 = vrot.lane.b32.xlu1 %v901_v12, %s3576_s27  ;;  %3324 = vmatpush3.bf16.msra.mxu0 %v1364_v4  ;;  %v1057_v12 = vshll.u32 %v4018_v61, 16  ;;  %v1157_v43 = vsel %vm636_vm0, %v1155_v23, %v1156_v28  ;;  %v359_v4 = vld [vmem:[%s3629_s22 + $0x30] sm:$0xe]  ;;  %v1771_v10 = vshll.u32 %v4078_v54, 16  ;;  %v554_v15 = vor.u32 %v553_v41, %v549_v49 }
  0x74   : > { %v4108_v61 = vcombine.low %v3092_v56, %v4089_v57  ;;  %v568_v28 = vshll.u32 %v4102_v13, 16 }
  0x75   : > { %859 = vrot.lane.b32.xlu0 %v804_v27, %s3575_s26  ;;  %v2994_v27 = vld [vmem:[%s3629_s22 + $0x3c] sm:$0xe] }
  0x76   : > { %v3066_v29 = vcombine.low %v2994_v27, %v3992_v35 }
  0x77   : > { %2135 = vrot.lane.b32.xlu1 %v2115_v30, %s3576_s27  ;;  %v2271_v30 = vshll.u32 %v4035_v18, 16 }
  0x79   : > { %2073 = vrot.lane.b32.xlu0 %v2018_v36, %s3575_s26  ;;  %v2273_v48 = vrot.slane %v2271_v30, 1  ;;  %v559_v30 = vsel %vm499_vm1, %v554_v15, %v558_v16 }
  0x7b   : > { %977 = vrot.lane.b32.xlu1 %v3049_v63, %s3577_s30  ;;  %v2266_v63 = vshll.u32 %v3229_v58, 16 }
  0x7d   : > { %923 = vrot.lane.b32.xlu0 %v904_v47, %s3576_s27  ;;  %v2268_v31 = vrot.slane %v2266_v63, 1  ;;  %v3019_v63 = vcombine.low %v359_v4, %v4032_v11  ;;  %v561_v11 = vshrl.u32 %v4084_v45, 16 }
  0x7f   : > { %2191 = vrot.lane.b32.xlu1 %v3228_v22, %s3577_s30  ;;  %v1059_v22 = vrot.slane %v1057_v12, 1  ;;  %v2269_v50 = vor.u32 %v2268_v31, %v2264_v32  ;;  %v4122_v32 = vld [vmem:[%s3629_s22 + $0xa4] ss:$0 sps:$4 sm:$0x11]   ;;  %v649_v24 = vrot.slane %v3019_v63, 1 }
  0x80   : > { %v1783_v49 = vshll.u32 %v4122_v32, 16 }
  0x81   : > { %2137 = vrot.lane.b32.xlu0 %v2118_v0, %s3576_s27  ;;  %v1060_v35 = vsel %vm499_vm1, %v1055_v25, %v1059_v22  ;;  %v1158_v0 = vrot.slane %v3066_v29, 1  ;;  %v2274_v5 = vsel %vm499_vm1, %v2269_v50, %v2273_v48  ;;  %v3110_v25 = vld [vmem:[%s3629_s22 + $0x90] sm:$0xe]  ;;  %v565_v22 = vrot.slane %v563_v7, 1  ;;  %v3111_v7 = vld [vmem:[%s3629_s22 + $0x9c] sm:$0xe] }
  0x82   : > { %v650_v29 = vrot.slane %v4061_v37, 1  ;;  %v3198_v1 = vcombine.low %v3110_v25, %v4046_v20  ;;  %v1776_v37 = vshrl.u32 %v4108_v61, 16  ;;  %v4174_v25 = vld [vmem:[%s3629_s22 + $0x4c] sm:$0xf] }
  0x83   : > { %1113 = vrot.lane.b32.xlu1 %v1048_v42, %s3578_s9  ;;  %v1768_v42 = vrot.slane %v1766_v53, 1  ;;  %v1160_v12 = vsel %vm636_vm0, %v1158_v0, %v1159_v60  ;;  %v566_v50 = vor.u32 %v565_v22, %v561_v11  ;;  %v3122_v0 = vld [vmem:[%s3629_s22 + $0x9c] sm:$0xf]  ;;  %v4150_v60 = vld [vmem:[%s3629_s22 + $0xa0] sm:$0xf] }
  0x84   : > { %v651_v56 = vsel %vm636_vm0, %v649_v24, %v650_v29  ;;  %v1863_v59 = vrot.slane %v3198_v1, 1  ;;  %v3206_v16 = vcombine.low %v3122_v0, %v4150_v60  ;;  %v4181_v29 = vld [vmem:[%s3629_s22 + $0xa4] ss:$0 sps:$4 sm:$0x11]  }
  0x85   : > { %979 = vrot.lane.b32.xlu0 %v3050_v44, %s3577_s30  ;;  %v2369_v44 = vrot.slane %v3244_v14, 1  ;;  %v2373_v14 = vrot.slane %v4035_v18, 1  ;;  %v1769_v27 = vor.u32 %v1768_v42, %v1764_v6  ;;  %v1778_v18 = vshll.u32 %v4108_v61, 16 }
  0x86   : > { %v1785_v42 = vrot.slane %v1783_v49, 1  ;;  %v2022_v11 = vshll.u32 %v3206_v16, 16 }
  0x87   : > { %v4058_v36 = vpop.permute.xlu1 %717  ;;  %2327 = vrot.lane.b32.xlu1 %v2262_v9, %s3578_s9  ;;  %v2371_v62 = vsel %vm636_vm0, %v2369_v44, %v2370_v46  ;;  %v1773_v9 = vrot.slane %v1771_v10, 1  ;;  %v2374_v38 = vsel %vm636_vm0, %v2372_v8, %v2373_v14  ;;  %v4133_v44 = vld [vmem:[%s3629_s22 + $0x40] sm:$0xf]  ;;  %v1780_v53 = vrot.slane %v1778_v18, 1 }
  0x88   : > { %v3020_v10 = vcombine.low %v360_v55, %v4068_v39  ;;  %v2024_v55 = vrot.slane %v2022_v11, 1  ;;  %v4218_v11 = vld [vmem:[%s3629_s22 + $0xb0] ss:$0 sps:$4 sm:$0x11]  }
  0x89   : > { %2193 = vrot.lane.b32.xlu0 %v3229_v58, %s3577_s30  ;;  %v1774_v48 = vsel %vm499_vm1, %v1769_v27, %v1773_v9  ;;  %v1781_v6 = vor.u32 %v1780_v53, %v1776_v37  ;;  %v653_v27 = vrot.slane %v4102_v13, 1  ;;  %v3199_v9 = vcombine.low %v3111_v7, %v4089_v57 }
  0x8a   : > { %v652_v39 = vrot.slane %v3020_v10, 1  ;;  %v2020_v37 = vshrl.u32 %v3206_v16, 16  ;;  %v3142_v10 = vld [vmem:[%s3629_s22 + $0x9c] sm:$0xe] }
  0x8b   : > { %v4074_v47 = vpop.permute.xlu0 %663  ;;  %1177 = vrot.lane.b32.xlu1 %v1157_v43, %s3579_s12  ;;  %v2943_v43 = vld [vmem:[%s3629_s22 + $0x3c] sm:$0xf]  ;;  %v1786_v14 = vsel %vm499_vm1, %v1781_v6, %v1785_v42  ;;  %v1866_v1 = vrot.slane %v3199_v9, 1 }
  0x8c   : > { %v4092_v58 = vpop.permute.xlu1 %661  ;;  %v3027_v41 = vcombine.low %v2943_v43, %v4133_v44  ;;  %v1867_v43 = vrot.slane %v4122_v32, 1  ;;  %v2025_v7 = vor.u32 %v2024_v55, %v2020_v37 }
  0x8d   : > { %1115 = vrot.lane.b32.xlu0 %v1060_v35, %s3578_s9  ;;  %v570_v35 = vrot.slane %v568_v28, 1  ;;  %v2945_v28 = vld [vmem:[%s3629_s22 + $0x48] sm:$0xf] }
  0x8e   : > { %v806_v22 = vshrl.u32 %v3027_v41, 16  ;;  %v3028_v57 = vcombine.low %v2945_v28, %v4174_v25  ;;  %v2975_v28 = vld [vmem:[%s3629_s22 + $0x48] sm:$0xf] }
  0x8f   : > { %v4104_v52 = vpop.permute.xlu0 %1877  ;;  %2391 = vrot.lane.b32.xlu1 %v2371_v62, %s3579_s12  ;;  %v1864_v62 = vrot.slane %v4078_v54, 1  ;;  %v808_v54 = vshll.u32 %v3027_v41, 16 }
  0x90   : > { %v820_v32 = vshll.u32 %v3028_v57, 16 }
  0x91   : > { %v4114_v23 = vpop.permute.xlu1 %1875  ;;  %2329 = vrot.lane.b32.xlu0 %v2274_v5, %s3578_s9  ;;  %v571_v5 = vsel %vm499_vm1, %v566_v50, %v570_v35  ;;  %v1865_v63 = vsel %vm636_vm0, %v1863_v59, %v1864_v62  ;;  %v810_v18 = vrot.slane %v808_v54, 1  ;;  %v4191_v35 = vld [vmem:[%s3629_s22 + $0xac] sm:$0xf]  ;;  %v2963_v59 = vld [vmem:[%s3629_s22 + $0x3c] sm:$0xe] }
  0x92   : > { %v3043_v42 = vcombine.low %v2963_v59, %v4133_v44  ;;  %v822_v9 = vrot.slane %v820_v32, 1 }
  0x93   : > { %1179 = vrot.lane.b32.xlu1 %v1160_v12, %s3579_s12  ;;  %v4126_v31 = vpop.permute.xlu0 %596  ;;  %v4164_v12 = vld [vmem:[%s3629_s22 + $0x44] ss:$0 sps:$4 sm:$0x11]   ;;  %v811_v53 = vor.u32 %v810_v18, %v806_v22  ;;  %v4221_v22 = vld [vmem:[%s3629_s22 + $0x4c] sm:$0xf]  ;;  %v3222_v18 = vcombine.low %v3142_v10, %v4150_v60 }
  0x94   : > { %v813_v24 = vshll.u32 %v4164_v12, 16  ;;  %v4245_v10 = vld [vmem:[%s3629_s22 + $0xac] sm:$0xf] }
  0x95   : > { %v4135_v46 = vpop.permute.xlu1 %1931  ;;  %604 = vrot.lane.b32.xlu0 %v559_v30, %s3574_s25  ;;  %v2119_v32 = vrot.slane %v3222_v18, 1 }
  0x96   : > { %v815_v49 = vrot.slane %v813_v24, 1 }
  0x97   : > { %2393 = vrot.lane.b32.xlu1 %v2374_v38, %s3579_s12  ;;  %v4142_v20 = vpop.permute.xlu0 %1811  ;;  %v654_v38 = vsel %vm636_vm0, %v652_v39, %v653_v27  ;;  %v818_v27 = vshrl.u32 %v3028_v57, 16 }
  0x98   : > { %v816_v54 = vsel %vm499_vm1, %v811_v53, %v815_v49  ;;  %v4234_v53 = vcombine.low %v2975_v28, %v4221_v22 }
  0x99   : > { %v4152_v4 = vpop.permute.xlu1 %598  ;;  %1819 = vrot.lane.b32.xlu0 %v1774_v48, %s3574_s25  ;;  %v3124_v48 = vld [vmem:[%s3629_s22 + $0xa8] sm:$0xf]  ;;  %v823_v37 = vor.u32 %v822_v9, %v818_v27  ;;  %v4254_v9 = vld [vmem:[%s3629_s22 + $0x50] ss:$0 sps:$4 sm:$0x11]  }
  0x9a   : > { %v3207_v0 = vcombine.low %v3124_v48, %v4191_v35  ;;  %v2964_v48 = vld [vmem:[%s3629_s22 + $0x48] sm:$0xe] }
  0x9b   : > { %669 = vrot.lane.b32.xlu1 %v651_v56, %s3573_s24  ;;  %v4158_v15 = vpop.permute.xlu0 %1813  ;;  %v2027_v56 = vshll.u32 %v4181_v29, 16  ;;  %v3044_v59 = vcombine.low %v2964_v48, %v4174_v25  ;;  %v4274_v48 = vld [vmem:[%s3629_s22 + $0x48] sm:$0xe] }
  0x9c   : > { %v2034_v39 = vshll.u32 %v3207_v0, 16  ;;  %v2032_v55 = vshrl.u32 %v3207_v0, 16 }
  0x9d   : > { %v4166_v8 = vpop.permute.xlu1 %853  ;;  %606 = vrot.lane.b32.xlu0 %v571_v5, %s3574_s25  ;;  %v4204_v5 = vld [vmem:[%s3629_s22 + $0x50] ss:$0 sps:$4 sm:$0x11]   ;;  %v908_v18 = vrot.slane %v3044_v59, 1 }
  0x9e   : > { %v2036_v60 = vrot.slane %v2034_v39, 1 }
  0x9f   : > { %1883 = vrot.lane.b32.xlu1 %v1865_v63, %s3573_s24  ;;  %v4177_v30 = vpop.permute.xlu0 %719  ;;  %v2029_v63 = vrot.slane %v2027_v56, 1  ;;  %v2039_v56 = vshll.u32 %v4218_v11, 16 }
  0xa0   : > { %v2037_v25 = vor.u32 %v2036_v60, %v2032_v55  ;;  %v1069_v60 = vshll.u32 %v4254_v9, 16 }
  0xa1   : > { %v4183_v13 = vpop.permute.xlu1 %2067  ;;  %1821 = vrot.lane.b32.xlu0 %v1786_v14, %s3574_s25  ;;  %v2030_v24 = vsel %vm499_vm1, %v2025_v7, %v2029_v63  ;;  %v1064_v7 = vshll.u32 %v4234_v53, 16  ;;  %v3143_v63 = vld [vmem:[%s3629_s22 + $0xa8] sm:$0xe]  ;;  %v2041_v27 = vrot.slane %v2039_v56, 1 }
  0xa2   : > { %v4282_v56 = vld [vmem:[%s3629_s22 + $0xb0] ss:$0 sps:$4 sm:$0x11]  }
  0xa3   : > { %725 = vrot.lane.b32.xlu1 %v3027_v41, %s3572_s23  ;;  %v4194_v50 = vpop.permute.xlu0 %1933  ;;  %v1868_v41 = vsel %vm636_vm0, %v1866_v1, %v1867_v43  ;;  %v906_v1 = vrot.slane %v4164_v12, 1 }
  0xa5   : > { %v4198_v62 = vpop.permute.xlu1 %917  ;;  %671 = vrot.lane.b32.xlu0 %v654_v38, %s3573_s24  ;;  %v905_v38 = vrot.slane %v3043_v42, 1  ;;  %v3154_v42 = vld [vmem:[%s3629_s22 + $0xa8] sm:$0xf] }
  0xa6   : > { %v4263_v28 = vcombine.low %v3154_v42, %v4245_v10  ;;  %v4298_v42 = vld [vmem:[%s3629_s22 + $0xa8] sm:$0xe] }
  0xa7   : > { %1939 = vrot.lane.b32.xlu1 %v3206_v16, %s3572_s23  ;;  %v4207_v6 = vpop.permute.xlu0 %855  ;;  %v825_v16 = vshll.u32 %v4204_v5, 16 }
  0xa9   : > { %v4212_v14 = vpop.permute.xlu1 %2131  ;;  %1885 = vrot.lane.b32.xlu0 %v1868_v41, %s3573_s24  ;;  %v827_v49 = vrot.slane %v825_v16, 1  ;;  %v2120_v41 = vrot.slane %v4181_v29, 1  ;;  %v1191_v29 = vsel %vm1189_vm3, %v3653_v17, %v4126_v31  ;;  %v3223_v17 = vcombine.low %v3143_v63, %v4191_v35 }
  0xaa   : > { %v1208_v55 = vsel %vm1206_vm4, %v1191_v29, %v4092_v58  ;;  %v2404_v35 = vsel %vm1189_vm3, %v3667_v33, %v4142_v20  ;;  %v2278_v58 = vshll.u32 %v4263_v28, 16  ;;  %v2123_v63 = vrot.slane %v4218_v11, 1 }
  0xab   : > { %861 = vrot.lane.b32.xlu1 %v816_v54, %s3575_s26  ;;  %v4224_v44 = vpop.permute.xlu0 %2069  ;;  %v828_v39 = vsel %vm499_vm1, %v823_v37, %v827_v49  ;;  %v2121_v16 = vsel %vm636_vm0, %v2119_v32, %v2120_v41  ;;  %v1062_v37 = vshrl.u32 %v4234_v53, 16  ;;  %v1066_v49 = vrot.slane %v1064_v7, 1 }
  0xac   : > { %v3067_v32 = vcombine.low %v4274_v48, %v4221_v22  ;;  %v1225_v33 = vsel %vm1223_vm5, %v1208_v55, %v4058_v36  ;;  %v2122_v7 = vrot.slane %v3223_v17, 1  ;;  %v2420_v22 = vsel %vm1206_vm4, %v2404_v35, %v4114_v23 }
  0xad   : > { %v4229_v43 = vpop.permute.xlu1 %973  ;;  %727 = vrot.lane.b32.xlu0 %v3028_v57, %s3572_s23  ;;  %v907_v57 = vsel %vm636_vm0, %v905_v38, %v906_v1  ;;  %v2977_v38 = vld [vmem:[%s3629_s22 + $0x54] sm:$0xf]  ;;  %v4269_v1 = vld [vmem:[%s3629_s22 + $0x58] sm:$0xf]  ;;  %v1242_v29 = vsel %vm1240_vm6, %v1225_v33, %v4166_v8  ;;  %v2283_v36 = vshll.u32 %v4282_v56, 16  ;;  %v2280_v17 = vrot.slane %v2278_v58, 1 }
  0xae   : > { %v3246_v8 = vcombine.low %v4298_v42, %v4245_v10  ;;  %v2124_v55 = vsel %vm636_vm0, %v2122_v7, %v2123_v63  ;;  %v4351_v33 = vld [vmem:[%s3629_s22 + $0x4c] sm:$0xf] }
  0xaf   : > { %2075 = vrot.lane.b32.xlu1 %v2030_v24, %s3575_s26  ;;  %v4238_v12 = vpop.permute.xlu0 %919  ;;  %v909_v24 = vrot.slane %v4204_v5, 1  ;;  %v2042_v5 = vsel %vm499_vm1, %v2037_v25, %v2041_v27  ;;  %v3156_v25 = vld [vmem:[%s3629_s22 + $0xb4] sm:$0xf]  ;;  %v4306_v27 = vld [vmem:[%s3629_s22 + $0xb8] sm:$0xf] }
  0xb0   : > { %v4326_v48 = vcombine.low %v3156_v25, %v4306_v27 }
  0xb1   : > { %v4247_v54 = vpop.permute.xlu1 %2187  ;;  %1941 = vrot.lane.b32.xlu0 %v3207_v0, %s3572_s23  ;;  %v910_v41 = vsel %vm636_vm0, %v908_v18, %v909_v24  ;;  %v1259_v18 = vsel %vm1257_vm7, %v1242_v29, %v4198_v62  ;;  %v4329_v62 = vld [vmem:[%s3629_s22 + $0x5c] ss:$0 sps:$4 sm:$0x11]  }
  0xb2   : > { %v1276_v23 = vsel %vm1274_vm8, %v1259_v18, %v4229_v43  ;;  %v1081_v63 = vshll.u32 %v4329_v62, 16  ;;  %v1162_v18 = vrot.slane %v4254_v9, 1  ;;  %v2288_v9 = vshrl.u32 %v4326_v48, 16 }
  0xb3   : > { %925 = vrot.lane.b32.xlu1 %v907_v57, %s3576_s27  ;;  %v4260_v0 = vpop.permute.xlu0 %2133  ;;  %v4292_v57 = vcombine.low %v2977_v38, %v4269_v1  ;;  %v2276_v38 = vshrl.u32 %v4263_v28, 16 }
  0xb5   : > { %v1110_v31 = vpop.permute.xlu1 %1109  ;;  %863 = vrot.lane.b32.xlu0 %v828_v39, %s3575_s26  ;;  %v1067_v39 = vor.u32 %v1066_v49, %v1062_v37  ;;  %v1076_v24 = vshll.u32 %v4292_v57, 16  ;;  %v2436_v37 = vsel %vm1223_vm5, %v2420_v22, %v4135_v46  ;;  %v1074_v58 = vshrl.u32 %v4292_v57, 16 }
  0xb6   : > { %v1293_v49 = vsel %vm1291_vm9, %v1276_v23, %v1110_v31  ;;  %v2281_v31 = vor.u32 %v2280_v17, %v2276_v38  ;;  %v2996_v23 = vld [vmem:[%s3629_s22 + $0x54] sm:$0xe] }
  0xb7   : > { %2139 = vrot.lane.b32.xlu1 %v2121_v16, %s3576_s27  ;;  %v4288_v59 = vpop.permute.xlu0 %975  ;;  %v1071_v16 = vrot.slane %v1069_v60, 1 }
  0xb9   : > { %v2324_v20 = vpop.permute.xlu1 %2323  ;;  %2077 = vrot.lane.b32.xlu0 %v2042_v5, %s3575_s26  ;;  %v2452_v5 = vsel %vm1240_vm6, %v2436_v37, %v4183_v13  ;;  %v1072_v35 = vsel %vm499_vm1, %v1067_v39, %v1071_v16  ;;  %v343_v13 = vld [vmem:[%s3629_s22 + $0x48] sm:$0xf]  ;;  %v2406_v39 = vsel %vm1189_vm3, %v3674_v40, %v4158_v15  ;;  %v4367_v16 = vld [vmem:[%s3629_s22 + $0xbc] ss:$0 sps:$4 sm:$0x11]  }
  0xba   : > { %v2468_v46 = vsel %vm1257_vm7, %v2452_v5, %v4212_v14  ;;  %v4374_v40 = vcombine.low %v343_v13, %v4351_v33  ;;  %v3094_v15 = vld [vmem:[%s3629_s22 + $0xa8] sm:$0xf]  ;;  %v2422_v38 = vsel %vm1206_vm4, %v2406_v39, %v4104_v52 }
  0xbb   : > { %981 = vrot.lane.b32.xlu1 %v4234_v53, %s3577_s30  ;;  %v4317_v11 = vpop.permute.xlu0 %2189  ;;  %v1193_v53 = vsel %vm1189_vm3, %v3661_v26, %v4152_v4  ;;  %v2285_v26 = vrot.slane %v2283_v36, 1  ;;  %v2484_v14 = vsel %vm1274_vm8, %v2468_v46, %v4247_v54  ;;  %v2438_v37 = vsel %vm1223_vm5, %v2422_v38, %v4194_v50  ;;  %v4404_v50 = vld [vmem:[%s3629_s22 + $0x50] ss:$0 sps:$4 sm:$0x11]  }
  0xbc   : > { %v1210_v7 = vsel %vm1206_vm4, %v1193_v53, %v4074_v47  ;;  %v2500_v22 = vsel %vm1291_vm9, %v2484_v14, %v2324_v20  ;;  %v1161_v47 = vrot.slane %v3067_v32, 1  ;;  %v1083_v53 = vrot.slane %v1081_v63, 1 }
  0xbd   : > { %v1174_v43 = vpop.permute.xlu1 %1173  ;;  %927 = vrot.lane.b32.xlu0 %v910_v41, %s3576_s27  ;;  %v1078_v41 = vrot.slane %v1076_v24, 1  ;;  %v1227_v25 = vsel %vm1223_vm5, %v1210_v7, %v4177_v30  ;;  %v4378_v30 = vld [vmem:[%s3629_s22 + $0xac] sm:$0xf]  ;;  %v2375_v46 = vrot.slane %v3246_v8, 1  ;;  %v573_v42 = vshrl.u32 %v4374_v40, 16 }
  0xbe   : > { %v1310_v60 = vsel %vm1308_vm10, %v1293_v49, %v1174_v43  ;;  %v1244_v54 = vsel %vm1240_vm6, %v1227_v25, %v4207_v6  ;;  %v2286_v6 = vsel %vm499_vm1, %v2281_v31, %v2285_v26  ;;  %v4398_v52 = vcombine.low %v3094_v15, %v4378_v30  ;;  %v4420_v31 = vld [vmem:[%s3629_s22 + $0x58] sm:$0xf]  ;;  %v4432_v8 = vld [vmem:[%s3629_s22 + $0xb0] ss:$0 sps:$4 sm:$0x11]  }
  0xbf   : > { %2195 = vrot.lane.b32.xlu1 %v4263_v28, %s3577_s30  ;;  %3325 = vmatprep.mubr.msk.bf16.mxu0 %vm1345_vm11, %v1310_v60  ;;  %v1112_v4 = vpop.permute.xlu0 %1111  ;;  %v2290_v28 = vshll.u32 %v4326_v48, 16  ;;  %v1261_v20 = vsel %vm1257_vm7, %v1244_v54, %v4238_v12  ;;  %v1079_v24 = vor.u32 %v1078_v41, %v1074_v58  ;;  %v575_v60 = vshll.u32 %v4374_v40, 16  ;;  %v3096_v25 = vld [vmem:[%s3629_s22 + $0xb4] sm:$0xf] }
  0xc0   : > { %v1278_v17 = vsel %vm1274_vm8, %v1261_v20, %v4288_v59  ;;  %v2454_v59 = vsel %vm1240_vm6, %v2438_v37, %v4224_v44  ;;  %v1163_v44 = vsel %vm636_vm0, %v1161_v47, %v1162_v18  ;;  %v2376_v41 = vrot.slane %v4282_v56, 1  ;;  %v361_v18 = vld [vmem:[%s3629_s22 + $0x48] sm:$0xe] }
  0xc1   : > { %v2388_v29 = vpop.permute.xlu1 %2387  ;;  %2141 = vrot.lane.b32.xlu0 %v2124_v55, %s3576_s27  ;;  %v2292_v12 = vrot.slane %v2290_v28, 1  ;;  %v1295_v49 = vsel %vm1291_vm9, %v1278_v17, %v1112_v4  ;;  %v2295_v55 = vshll.u32 %v4367_v16, 16  ;;  %v345_v4 = vld [vmem:[%s3629_s22 + $0x54] sm:$0xf]  ;;  %v1084_v58 = vsel %vm499_vm1, %v1079_v24, %v1083_v53 }
  0xc2   : > { %v2516_v36 = vsel %vm1308_vm10, %v2500_v22, %v2388_v29  ;;  %v577_v56 = vrot.slane %v575_v60, 1  ;;  %v580_v63 = vshll.u32 %v4404_v50, 16  ;;  %v4438_v39 = vcombine.low %v345_v4, %v4420_v31  ;;  %v4446_v22 = vld [vmem:[%s3629_s22 + $0xb8] sm:$0xf]  ;;  %v3112_v60 = vld [vmem:[%s3629_s22 + $0xa8] sm:$0xe] }
  0xc3   : > { %1117 = vrot.lane.b32.xlu1 %v1072_v35, %s3578_s9  ;;  %3347 = vmatprep.mubr.msk.bf16.mxu1 %vm1345_vm11, %v2516_v36  ;;  %v2326_v32 = vpop.permute.xlu0 %2325  ;;  %v2470_v35 = vsel %vm1257_vm7, %v2454_v59, %v4260_v0  ;;  %v2293_v13 = vor.u32 %v2292_v12, %v2288_v9  ;;  %v2297_v10 = vrot.slane %v2295_v55, 1  ;;  %v2377_v47 = vsel %vm636_vm0, %v2375_v46, %v2376_v41  ;;  %v4459_v9 = vld [vmem:[%s3629_s22 + $0x5c] ss:$0 sps:$4 sm:$0x11]  }
  0xc4   : > { %v2486_v0 = vsel %vm1274_vm8, %v2470_v35, %v4317_v11  ;;  %v1790_v11 = vshll.u32 %v4398_v52, 16  ;;  %v1165_v36 = vrot.slane %v4329_v62, 1  ;;  %v1795_v24 = vshll.u32 %v4432_v8, 16  ;;  %v4479_v46 = vld [vmem:[%s3629_s22 + $0xbc] ss:$0 sps:$4 sm:$0x11]  }
  0xc5   : > { %v1176_v43 = vpop.permute.xlu1 %1175  ;;  %983 = vrot.lane.b32.xlu0 %v4292_v57, %s3577_s30  ;;  %v3068_v57 = vcombine.low %v2996_v23, %v4269_v1  ;;  %v3175_v1 = vld [vmem:[%s3629_s22 + $0xb4] sm:$0xe]  ;;  %v2502_v7 = vsel %vm1291_vm9, %v2486_v0, %v2326_v32  ;;  %v2298_v20 = vsel %vm499_vm1, %v2293_v13, %v2297_v10  ;;  %v1788_v32 = vshrl.u32 %v4398_v52, 16  ;;  %v4494_v10 = vld [vmem:[%s3629_s22 + $0x58] sm:$0xf] }
  0xc6   : > { %v1312_v5 = vsel %vm1308_vm10, %v1295_v49, %v1176_v43  ;;  %v3247_v29 = vcombine.low %v3175_v1, %v4306_v27  ;;  %v578_v27 = vor.u32 %v577_v56, %v573_v42  ;;  %v582_v38 = vrot.slane %v580_v63, 1  ;;  %v362_v56 = vld [vmem:[%s3629_s22 + $0x54] sm:$0xe] }
  0xc7   : > { %2331 = vrot.lane.b32.xlu1 %v2286_v6, %s3578_s9  ;;  %3326 = vmatmul.mubr.msk.bf16.vlgmr.msra.gmra.mrb[0].mxu0 %vm1345_vm11, %v1312_v5  ;;  %v4412_v26 = vpop.permute.xlu0 %600  ;;  %v1164_v54 = vrot.slane %v3068_v57, 1  ;;  %v1792_v6 = vrot.slane %v1790_v11, 1  ;;  %v587_v17 = vshll.u32 %v4438_v39, 16  ;;  %v4463_v62 = vcombine.low %v3096_v25, %v4446_v22 }
  0xc8   : > { %v2378_v12 = vrot.slane %v3247_v29, 1  ;;  %v2379_v37 = vrot.slane %v4367_v16, 1  ;;  %v3021_v49 = vcombine.low %v361_v18, %v4351_v33  ;;  %v1797_v59 = vrot.slane %v1795_v24, 1  ;;  %v4510_v18 = vld [vmem:[%s3629_s22 + $0xb8] sm:$0xf] }
  0xc9   : > { %v2390_v14 = vpop.permute.xlu1 %2389  ;;  %2197 = vrot.lane.b32.xlu0 %v4326_v48, %s3577_s30  ;;  %v1166_v53 = vsel %vm636_vm0, %v1164_v54, %v1165_v36  ;;  %v1793_v55 = vor.u32 %v1792_v6, %v1788_v32  ;;  %v592_v5 = vshll.u32 %v4459_v9, 16  ;;  %v583_v35 = vsel %vm499_vm1, %v578_v27, %v582_v38  ;;  %v3126_v36 = vld [vmem:[%s3629_s22 + $0xb4] sm:$0xf]  ;;  %v4519_v38 = vld [vmem:[%s3629_s22 + $0x5c] ss:$0 sps:$4 sm:$0x11]  }
  0xca   : > { %v2518_v28 = vsel %vm1308_vm10, %v2502_v7, %v2390_v14  ;;  %v585_v57 = vshrl.u32 %v4438_v39, 16  ;;  %v1802_v33 = vshll.u32 %v4463_v62, 16  ;;  %v2380_v4 = vsel %vm636_vm0, %v2378_v12, %v2379_v37  ;;  %v2947_v14 = vld [vmem:[%s3629_s22 + $0x54] sm:$0xf] }
  0xcb   : > { %1181 = vrot.lane.b32.xlu1 %v1163_v44, %s3579_s12  ;;  %3348 = vmatmul.mubr.msk.bf16.vlgmr.msra.gmra.mrb[0].mxu1 %vm1345_vm11, %v2518_v28  ;;  %v4442_v48 = vpop.permute.xlu0 %1815  ;;  %v589_v44 = vrot.slane %v587_v17, 1  ;;  %v655_v0 = vrot.slane %v3021_v49, 1  ;;  %v656_v1 = vrot.slane %v4404_v50, 1  ;;  %v1798_v13 = vsel %vm499_vm1, %v1793_v55, %v1797_v59 }
  0xcc   : > { %v594_v7 = vrot.slane %v592_v5, 1  ;;  %v1800_v11 = vshrl.u32 %v4463_v62, 16  ;;  %v1804_v28 = vrot.slane %v1802_v33, 1  ;;  %v1807_v50 = vshll.u32 %v4479_v46, 16 }
  0xcd   : > { %v4452_v15 = vpop.permute.xlu1 %665  ;;  %1119 = vrot.lane.b32.xlu0 %v1084_v58, %s3578_s9  ;;  %v3200_v58 = vcombine.low %v3112_v60, %v4378_v30  ;;  %v590_v42 = vor.u32 %v589_v44, %v585_v57  ;;  %v657_v63 = vsel %vm636_vm0, %v655_v0, %v656_v1  ;;  %v1870_v29 = vrot.slane %v4432_v8, 1  ;;  %v3113_v8 = vld [vmem:[%s3629_s22 + $0xb4] sm:$0xe]  ;;  %v4535_v57 = vld [vmem:[%s3629_s22 + $0x64] sm:$0xf] }
  0xce   : > { %v1805_v32 = vor.u32 %v1804_v28, %v1800_v11  ;;  %v1809_v6 = vrot.slane %v1807_v50, 1  ;;  %v3022_v24 = vcombine.low %v362_v56, %v4420_v31  ;;  %v659_v55 = vrot.slane %v4459_v9, 1  ;;  %v4551_v11 = vld [vmem:[%s3629_s22 + $0xc4] sm:$0xf] }
  0xcf   : > { %2395 = vrot.lane.b32.xlu1 %v2377_v47, %s3579_s12  ;;  %v4466_v23 = vpop.permute.xlu0 %602  ;;  %v1869_v25 = vrot.slane %v3200_v58, 1  ;;  %v3029_v47 = vcombine.low %v2947_v14, %v4494_v10  ;;  %v3201_v59 = vcombine.low %v3113_v8, %v4446_v22  ;;  %v837_v60 = vshll.u32 %v4519_v38, 16 }
  0xd0   : > { %v1810_v31 = vsel %vm499_vm1, %v1805_v32, %v1809_v6  ;;  %v658_v49 = vrot.slane %v3022_v24, 1  ;;  %v1873_v58 = vrot.slane %v4479_v46, 1  ;;  %v2965_v46 = vld [vmem:[%s3629_s22 + $0x54] sm:$0xe] }
  0xd1   : > { %v4471_v43 = vpop.permute.xlu1 %1879  ;;  %2333 = vrot.lane.b32.xlu0 %v2298_v20, %s3578_s9  ;;  %v595_v20 = vsel %vm499_vm1, %v590_v42, %v594_v7  ;;  %v1871_v17 = vsel %vm636_vm0, %v1869_v25, %v1870_v29  ;;  %v832_v12 = vshll.u32 %v3029_v47, 16  ;;  %v830_v44 = vshrl.u32 %v3029_v47, 16  ;;  %v3128_v42 = vld [vmem:[%s3629_s22 + $0xc0] sm:$0xf] }
  0xd2   : > { %v660_v22 = vsel %vm636_vm0, %v658_v49, %v659_v55  ;;  %v1872_v9 = vrot.slane %v3201_v59, 1  ;;  %v839_v14 = vrot.slane %v837_v60, 1  ;;  %v4573_v49 = vld [vmem:[%s3629_s22 + $0xc8] ss:$0 sps:$4 sm:$0x11]  }
  0xd3   : > { %1183 = vrot.lane.b32.xlu1 %v1166_v53, %s3579_s12  ;;  %v4483_v16 = vpop.permute.xlu0 %1817  ;;  %v3208_v53 = vcombine.low %v3126_v36, %v4510_v18  ;;  %v834_v33 = vrot.slane %v832_v12, 1  ;;  %v4561_v36 = vld [vmem:[%s3629_s22 + $0x68] ss:$0 sps:$4 sm:$0x11]  }
  0xd4   : > { %v1874_v29 = vsel %vm636_vm0, %v1872_v9, %v1873_v58  ;;  %v4584_v9 = vld [vmem:[%s3629_s22 + $0x64] sm:$0xf] }
  0xd5   : > { %v4488_v41 = vpop.permute.xlu1 %721  ;;  %608 = vrot.lane.b32.xlu0 %v583_v35, %s3574_s25  ;;  %v2949_v35 = vld [vmem:[%s3629_s22 + $0x60] sm:$0xf]  ;;  %v2046_v0 = vshll.u32 %v3208_v53, 16  ;;  %v835_v28 = vor.u32 %v834_v33, %v830_v44  ;;  %v2044_v50 = vshrl.u32 %v3208_v53, 16  ;;  %v912_v33 = vrot.slane %v4519_v38, 1 }
  0xd7   : > { %2397 = vrot.lane.b32.xlu1 %v2380_v4, %s3579_s12  ;;  %v4499_v30 = vpop.permute.xlu0 %667  ;;  %v4538_v4 = vld [vmem:[%s3629_s22 + $0xbc] ss:$0 sps:$4 sm:$0x11]   ;;  %v2048_v56 = vrot.slane %v2046_v0, 1  ;;  %v840_v6 = vsel %vm499_vm1, %v835_v28, %v839_v14 }
  0xd9   : > { %v4505_v54 = vpop.permute.xlu1 %1935  ;;  %1823 = vrot.lane.b32.xlu0 %v1798_v13, %s3574_s25  ;;  %v3030_v13 = vcombine.low %v2949_v35, %v4535_v57  ;;  %v2049_v24 = vor.u32 %v2048_v56, %v2044_v50  ;;  %v2063_v56 = vshll.u32 %v4573_v49, 16 }
  0xdb   : > { %673 = vrot.lane.b32.xlu1 %v657_v63, %s3573_s24  ;;  %v4515_v27 = vpop.permute.xlu0 %1881  ;;  %v2051_v63 = vshll.u32 %v4538_v4, 16  ;;  %v842_v55 = vshrl.u32 %v3030_v13, 16 }
  0xdd   : > { %v4523_v37 = vpop.permute.xlu1 %857  ;;  %610 = vrot.lane.b32.xlu0 %v595_v20, %s3574_s25  ;;  %v844_v20 = vshll.u32 %v3030_v13, 16  ;;  %v2053_v8 = vrot.slane %v2051_v63, 1  ;;  %v2966_v63 = vld [vmem:[%s3629_s22 + $0x60] sm:$0xe] }
  0xdf   : > { %1887 = vrot.lane.b32.xlu1 %v1871_v17, %s3573_s24  ;;  %v4530_v5 = vpop.permute.xlu0 %723  ;;  %v3045_v17 = vcombine.low %v2965_v46, %v4494_v10  ;;  %v846_v59 = vrot.slane %v844_v20, 1  ;;  %v2054_v44 = vsel %vm499_vm1, %v2049_v24, %v2053_v8  ;;  %v4602_v24 = vld [vmem:[%s3629_s22 + $0xc4] sm:$0xf] }
  0xe1   : > { %v4540_v1 = vpop.permute.xlu1 %2071  ;;  %1825 = vrot.lane.b32.xlu0 %v1810_v31, %s3574_s25  ;;  %v3144_v31 = vld [vmem:[%s3629_s22 + $0xb4] sm:$0xe]  ;;  %v911_v10 = vrot.slane %v3045_v17, 1 }
  0xe2   : > { %v3224_v0 = vcombine.low %v3144_v31, %v4510_v18  ;;  %v2065_v31 = vrot.slane %v2063_v56, 1 }
  0xe3   : > { %729 = vrot.lane.b32.xlu1 %v3029_v47, %s3572_s23  ;;  %v4547_v7 = vpop.permute.xlu0 %1937  ;;  %v3209_v47 = vcombine.low %v3128_v42, %v4551_v11  ;;  %v847_v42 = vor.u32 %v846_v59, %v842_v55  ;;  %v913_v46 = vsel %vm636_vm0, %v911_v10, %v912_v33  ;;  %v3046_v55 = vcombine.low %v2966_v63, %v4535_v57  ;;  %v3145_v59 = vld [vmem:[%s3629_s22 + $0xc0] sm:$0xe]  ;;  %v2981_v57 = vld [vmem:[%s3629_s22 + $0x6c] sm:$0xf] }
  0xe4   : > { %v3225_v33 = vcombine.low %v3145_v59, %v4551_v11 }
  0xe5   : > { %v4554_v25 = vpop.permute.xlu1 %921  ;;  %675 = vrot.lane.b32.xlu0 %v660_v22, %s3573_s24  ;;  %v2058_v60 = vshll.u32 %v3209_v47, 16  ;;  %v2979_v22 = vld [vmem:[%s3629_s22 + $0x60] sm:$0xf]  ;;  %v2056_v14 = vshrl.u32 %v3209_v47, 16 }
  0xe6   : > { %v3053_v38 = vcombine.low %v2979_v22, %v4584_v9  ;;  %v914_v22 = vrot.slane %v3046_v55, 1  ;;  %v3160_v55 = vld [vmem:[%s3629_s22 + $0xcc] sm:$0xf] }
  0xe7   : > { %1943 = vrot.lane.b32.xlu1 %v3208_v53, %s3572_s23  ;;  %v4564_v32 = vpop.permute.xlu0 %859  ;;  %v849_v53 = vshll.u32 %v4561_v36, 16  ;;  %v2060_v50 = vrot.slane %v2058_v60, 1 }
  0xe8   : > { %v1088_v60 = vshll.u32 %v3053_v38, 16  ;;  %v1086_v11 = vshrl.u32 %v3053_v38, 16 }
  0xe9   : > { %v4568_v12 = vpop.permute.xlu1 %2135  ;;  %1889 = vrot.lane.b32.xlu0 %v1874_v29, %s3573_s24  ;;  %v851_v28 = vrot.slane %v849_v53, 1  ;;  %v2125_v29 = vrot.slane %v3224_v0, 1  ;;  %v2061_v17 = vor.u32 %v2060_v50, %v2056_v14  ;;  %v4608_v53 = vld [vmem:[%s3629_s22 + $0x68] ss:$0 sps:$4 sm:$0x11]   ;;  %v915_v14 = vrot.slane %v4561_v36, 1  ;;  %s4839_s24 = scalar_lea.vmem %s4991_s3, %s3295_s21 }
  0xea   : > { %v1195_v50 = vsel %vm1189_vm3, %v3813_v51, %v4412_v26  ;;  %v1090_v63 = vrot.slane %v1088_v60, 1  ;;  %v2128_v51 = vrot.slane %v3225_v33, 1  ;;  %v2129_v26 = vrot.slane %v4573_v49, 1  ;;  %v2997_v33 = vld [vmem:[%s3629_s22 + $0x60] sm:$0xe] }
  0xeb   : > { %865 = vrot.lane.b32.xlu1 %v840_v6, %s3575_s26  ;;  %v4577_v35 = vpop.permute.xlu0 %2073  ;;  %v3158_v6 = vld [vmem:[%s3629_s22 + $0xc0] sm:$0xf]  ;;  %v852_v8 = vsel %vm499_vm1, %v847_v42, %v851_v28  ;;  %v2066_v0 = vsel %vm499_vm1, %v2061_v17, %v2065_v31  ;;  %v1093_v42 = vshll.u32 %v4608_v53, 16  ;;  %v4622_v28 = vld [vmem:[%s3629_s22 + $0x70] sm:$0xf]  ;;  %v1212_v36 = vsel %vm1206_vm4, %v1195_v50, %v4452_v15 }
  0xec   : > { %v916_v15 = vsel %vm636_vm0, %v914_v22, %v915_v14  ;;  %v1091_v60 = vor.u32 %v1090_v63, %v1086_v11  ;;  %v4664_v22 = vld [vmem:[%s3629_s22 + $0x74] ss:$0 sps:$4 sm:$0x11]  }
  0xed   : > { %v4586_v58 = vpop.permute.xlu1 %977  ;;  %731 = vrot.lane.b32.xlu0 %v3030_v13, %s3572_s23  ;;  %v2126_v13 = vrot.slane %v4538_v4, 1  ;;  %v1095_v31 = vrot.slane %v1093_v42, 1  ;;  %v2130_v42 = vsel %vm636_vm0, %v2128_v51, %v2129_v26 }
  0xef   : > { %2079 = vrot.lane.b32.xlu1 %v2054_v44, %s3575_s26  ;;  %v4591_v18 = vpop.permute.xlu0 %923  ;;  %v3232_v44 = vcombine.low %v3158_v6, %v4602_v24 }
  0xf1   : > { %v4597_v20 = vpop.permute.xlu1 %2191  ;;  %1945 = vrot.lane.b32.xlu0 %v3209_v47, %s3572_s23  ;;  %v2127_v47 = vsel %vm636_vm0, %v2125_v29, %v2126_v13  ;;  %v2302_v29 = vshll.u32 %v3232_v44, 16  ;;  %v1229_v13 = vsel %vm1223_vm5, %v1212_v36, %v4488_v41  ;;  %v2408_v41 = vsel %vm1189_vm3, %v3830_v3, %v4442_v48 }
  0xf2   : > { %v1246_v17 = vsel %vm1240_vm6, %v1229_v13, %v4523_v37  ;;  %v4656_v37 = vld [vmem:[%s3629_s22 + $0xd0] sm:$0xf]  ;;  %v2300_v3 = vshrl.u32 %v3232_v44, 16 }
  0xf3   : > { %929 = vrot.lane.b32.xlu1 %v913_v46, %s3576_s27  ;;  %v4611_v4 = vpop.permute.xlu0 %2137  ;;  %v4631_v46 = vld [vmem:[%s3629_s22 + $0xc8] ss:$0 sps:$4 sm:$0x11]   ;;  %v1263_v59 = vsel %vm1257_vm7, %v1246_v17, %v4554_v25  ;;  %v2304_v48 = vrot.slane %v2302_v29, 1  ;;  %v4676_v11 = vcombine.low %v3160_v55, %v4656_v37 }
  0xf4   : > { %v3545_v55 = vld [vmem:[%s3629_s22 + $0xd4] ss:$0 sps:$4 sm:$0x11]  }
  0xf5   : > { %v1114_v10 = vpop.permute.xlu1 %1113  ;;  %867 = vrot.lane.b32.xlu0 %v852_v8, %s3575_s26  ;;  %v4640_v8 = vcombine.low %v2981_v57, %v4622_v28  ;;  %v2424_v57 = vsel %vm1206_vm4, %v2408_v41, %v4471_v43  ;;  %v2305_v51 = vor.u32 %v2304_v48, %v2300_v3  ;;  %v2314_v41 = vshll.u32 %v4676_v11, 16  ;;  %v3177_v3 = vld [vmem:[%s3629_s22 + $0xcc] sm:$0xe] }
  0xf6   : > { %v2440_v25 = vsel %vm1223_vm5, %v2424_v57, %v4505_v54  ;;  %v3069_v54 = vcombine.low %v2997_v33, %v4584_v9 }
  0xf7   : > { %2143 = vrot.lane.b32.xlu1 %v2127_v47, %s3576_s27  ;;  %v4628_v56 = vpop.permute.xlu0 %979  ;;  %v2307_v47 = vshll.u32 %v4631_v46, 16  ;;  %v1100_v50 = vshll.u32 %v4640_v8, 16  ;;  %v2456_v43 = vsel %vm1240_vm6, %v2440_v25, %v4540_v1  ;;  %v1096_v1 = vsel %vm499_vm1, %v1091_v60, %v1095_v31 }
  0xf8   : > { %v2472_v63 = vsel %vm1257_vm7, %v2456_v43, %v4568_v12  ;;  %v1098_v17 = vshrl.u32 %v4640_v8, 16  ;;  %v1168_v31 = vrot.slane %v4608_v53, 1  ;;  %v2316_v48 = vrot.slane %v2314_v41, 1 }
  0xf9   : > { %v2328_v6 = vpop.permute.xlu1 %2327  ;;  %2081 = vrot.lane.b32.xlu0 %v2066_v0, %s3575_s26  ;;  %v1280_v0 = vsel %vm1274_vm8, %v1263_v59, %v4586_v58  ;;  %v2309_v29 = vrot.slane %v2307_v47, 1  ;;  %v2488_v9 = vsel %vm1274_vm8, %v2472_v63, %v4597_v20  ;;  %v1167_v59 = vrot.slane %v3069_v54, 1 }
  0xfa   : > { %v2319_v25 = vshll.u32 %v3545_v55, 16  ;;  %v3249_v43 = vcombine.low %v3177_v3, %v4656_v37 }
  0xfb   : > { %985 = vrot.lane.b32.xlu1 %v3053_v38, %s3577_s30  ;;  %v4652_v49 = vpop.permute.xlu0 %2193  ;;  %v1297_v38 = vsel %vm1291_vm9, %v1280_v0, %v1114_v10  ;;  %v1197_v10 = vsel %vm1189_vm3, %v3854_v2, %v4466_v23  ;;  %v1105_v2 = vshll.u32 %v4664_v22, 16  ;;  %v3176_v23 = vld [vmem:[%s3629_s22 + $0xc0] sm:$0xe]  ;;  %v2312_v0 = vshrl.u32 %v4676_v11, 16 }
  0xfc   : > { %v1214_v13 = vsel %vm1206_vm4, %v1197_v10, %v4499_v30  ;;  %v3248_v60 = vcombine.low %v3176_v23, %v4602_v24  ;;  %v2384_v37 = vrot.slane %v3249_v43, 1 }
  0xfd   : > { %v1178_v14 = vpop.permute.xlu1 %1177  ;;  %931 = vrot.lane.b32.xlu0 %v916_v15, %s3576_s27  ;;  %v1231_v12 = vsel %vm1223_vm5, %v1214_v13, %v4530_v5  ;;  %v1102_v15 = vrot.slane %v1100_v50, 1  ;;  %v2410_v5 = vsel %vm1189_vm3, %v3874_v34, %v4483_v16  ;;  %v2310_v34 = vsel %vm499_vm1, %v2305_v51, %v2309_v29 }
  0xfe   : > { %v1314_v58 = vsel %vm1308_vm10, %v1297_v38, %v1178_v14  ;;  %v1248_v30 = vsel %vm1240_vm6, %v1231_v12, %v4564_v32  ;;  %v2426_v53 = vsel %vm1206_vm4, %v2410_v5, %v4515_v27  ;;  %v1107_v16 = vrot.slane %v1105_v2, 1  ;;  %v2998_v38 = vld [vmem:[%s3629_s22 + $0x6c] sm:$0xe] }
  0xff   : > { %2199 = vrot.lane.b32.xlu1 %v3232_v44, %s3577_s30  ;;  %3329 = vmatprep.mubr.msk.bf16.mxu0 %vm1345_vm11, %v1314_v58  ;;  %v1116_v36 = vpop.permute.xlu0 %1115  ;;  %v2504_v44 = vsel %vm1291_vm9, %v2488_v9, %v2328_v6  ;;  %v1265_v6 = vsel %vm1257_vm7, %v1248_v30, %v4591_v18  ;;  %v2442_v18 = vsel %vm1223_vm5, %v2426_v53, %v4547_v7  ;;  %v2381_v50 = vrot.slane %v3248_v60, 1 }
 0x100   : > { %v1282_v47 = vsel %vm1274_vm8, %v1265_v6, %v4628_v56  ;;  %v1103_v24 = vor.u32 %v1102_v15, %v1098_v17  ;;  %v2458_v27 = vsel %vm1240_vm6, %v2442_v18, %v4577_v35  ;;  %v1169_v14 = vsel %vm636_vm0, %v1167_v59, %v1168_v31 }
 0x101   : > { %v2392_v26 = vpop.permute.xlu1 %2391  ;;  %2145 = vrot.lane.b32.xlu0 %v2130_v42, %s3576_s27  ;;  %v1299_v33 = vsel %vm1291_vm9, %v1282_v47, %v1116_v36  ;;  %v2474_v7 = vsel %vm1257_vm7, %v2458_v27, %v4611_v4  ;;  %v2382_v35 = vrot.slane %v4631_v46, 1  ;;  %v3070_v4 = vcombine.low %v2998_v38, %v4622_v28 }
 0x102   : > { %v2520_v20 = vsel %vm1308_vm10, %v2504_v44, %v2392_v26  ;;  %v2490_v42 = vsel %vm1274_vm8, %v2474_v7, %v4652_v49  ;;  %v1108_v63 = vsel %vm499_vm1, %v1103_v24, %v1107_v16  ;;  %v2317_v36 = vor.u32 %v2316_v48, %v2312_v0 }
 0x103   : > { %1121 = vrot.lane.b32.xlu1 %v1096_v1, %s3578_s9  ;;  %3351 = vmatprep.mubr.msk.bf16.mxu1 %vm1345_vm11, %v2520_v20  ;;  %v2330_v32 = vpop.permute.xlu0 %2329  ;;  %v2321_v1 = vrot.slane %v2319_v25, 1  ;;  %v2383_v49 = vsel %vm636_vm0, %v2381_v50, %v2382_v35  ;;  %v2385_v29 = vrot.slane %v3545_v55, 1  ;;  %v1171_v9 = vrot.slane %v4664_v22, 1 }
 0x104   : > { %v2506_v58 = vsel %vm1291_vm9, %v2490_v42, %v2330_v32 }
 0x105   : > { %v1180_v57 = vpop.permute.xlu1 %1179  ;;  %987 = vrot.lane.b32.xlu0 %v4640_v8, %s3577_s30  ;;  %v2322_v28 = vsel %vm499_vm1, %v2317_v36, %v2321_v1  ;;  %v2386_v2 = vsel %vm636_vm0, %v2384_v37, %v2385_v29 }
 0x106   : > { %v1316_v56 = vsel %vm1308_vm10, %v1299_v33, %v1180_v57 }
 0x107   : > { %2335 = vrot.lane.b32.xlu1 %v2310_v34, %s3578_s9  ;;  %3330 = vmatmul.mubr.msk.bf16.gmra.mrb[4].mxu0 %vm1345_vm11, %v1316_v56  ;;  %v605_v8 = vpop.permute.xlu0 %604 }
 0x108   : > { %v1199_v16 = vsel %vm1189_vm3, %v4042_v19, %v605_v8 }
 0x109   : > { %v2394_v54 = vpop.permute.xlu1 %2393  ;;  %2201 = vrot.lane.b32.xlu0 %v4676_v11, %s3577_s30  ;;  %v1170_v11 = vrot.slane %v3070_v4, 1 }
 0x10a   : > { %v2522_v10 = vsel %vm1308_vm10, %v2506_v58, %v2394_v54 }
 0x10b   : > { %1185 = vrot.lane.b32.xlu1 %v1169_v14, %s3579_s12  ;;  %3352 = vmatmul.mubr.msk.bf16.gmra.mrb[4].mxu1 %vm1345_vm11, %v2522_v10  ;;  %v1820_v46 = vpop.permute.xlu0 %1819  ;;  %v1172_v12 = vsel %vm636_vm0, %v1170_v11, %v1171_v9 }
 0x10c   : > { %v2412_v3 = vsel %vm1189_vm3, %v4056_v21, %v1820_v46 }
 0x10d   : > { %v670_v13 = vpop.permute.xlu1 %669  ;;  %1123 = vrot.lane.b32.xlu0 %v1108_v63, %s3578_s9 }
 0x10e   : > { %v1216_v33 = vsel %vm1206_vm4, %v1199_v16, %v670_v13 }
 0x10f   : > { %2399 = vrot.lane.b32.xlu1 %v2383_v49, %s3579_s12  ;;  %v607_v51 = vpop.permute.xlu0 %606 }
 0x110   : > { %v1201_v42 = vsel %vm1189_vm3, %v4084_v45, %v607_v51 }
 0x111   : > { %v1884_v23 = vpop.permute.xlu1 %1883  ;;  %2337 = vrot.lane.b32.xlu0 %v2322_v28, %s3578_s9 }
 0x112   : > { %v2428_v48 = vsel %vm1206_vm4, %v2412_v3, %v1884_v23 }
 0x113   : > { %2401 = vrot.lane.b32.xlu1 %v2386_v2, %s3579_s12  ;;  %v1822_v44 = vpop.permute.xlu0 %1821 }
 0x114   : > { %v2414_v45 = vsel %vm1189_vm3, %v4108_v61, %v1822_v44 }
 0x115   : > { %v726_v26 = vpop.permute.xlu1 %725  ;;  %1187 = vrot.lane.b32.xlu0 %v1172_v12, %s3579_s12 }
 0x116   : > { %v1233_v57 = vsel %vm1223_vm5, %v1216_v33, %v726_v26 }
 0x117   : > { %v672_v17 = vpop.permute.xlu0 %671 }
 0x118   : > { %v1218_v35 = vsel %vm1206_vm4, %v1201_v42, %v672_v17 }
 0x119   : > { %v1940_v15 = vpop.permute.xlu1 %1939 }
 0x11a   : > { %v2444_v19 = vsel %vm1223_vm5, %v2428_v48, %v1940_v15 }
 0x11b   : > { %v1886_v30 = vpop.permute.xlu0 %1885 }
 0x11c   : > { %v2430_v46 = vsel %vm1206_vm4, %v2414_v45, %v1886_v30 }
 0x11d   : > { %v862_v22 = vpop.permute.xlu1 %861 }
 0x11e   : > { %v1250_v0 = vsel %vm1240_vm6, %v1233_v57, %v862_v22 }
 0x11f   : > { %v728_v20 = vpop.permute.xlu0 %727 }
 0x120   : > { %v1235_v58 = vsel %vm1223_vm5, %v1218_v35, %v728_v20 }
 0x121   : > { %v2076_v31 = vpop.permute.xlu1 %2075 }
 0x122   : > { %v2460_v8 = vsel %vm1240_vm6, %v2444_v19, %v2076_v31 }
 0x123   : > { %v1942_v55 = vpop.permute.xlu0 %1941 }
 0x124   : > { %v2446_v37 = vsel %vm1223_vm5, %v2430_v46, %v1942_v55 }
 0x125   : > { %v926_v41 = vpop.permute.xlu1 %925 }
 0x126   : > { %v1267_v27 = vsel %vm1257_vm7, %v1250_v0, %v926_v41 }
 0x127   : > { %v864_v5 = vpop.permute.xlu0 %863 }
 0x128   : > { %v1252_v10 = vsel %vm1240_vm6, %v1235_v58, %v864_v5 }
 0x129   : > { %v2140_v6 = vpop.permute.xlu1 %2139 }
 0x12a   : > { %v2476_v21 = vsel %vm1257_vm7, %v2460_v8, %v2140_v6 }
 0x12b   : > { %v2078_v32 = vpop.permute.xlu0 %2077 }
 0x12c   : > { %v2462_v28 = vsel %vm1240_vm6, %v2446_v37, %v2078_v32 }
 0x12d   : > { %v982_v59 = vpop.permute.xlu1 %981 }
 0x12e   : > { %v1284_v25 = vsel %vm1274_vm8, %v1267_v27, %v982_v59 }
 0x12f   : > { %v928_v60 = vpop.permute.xlu0 %927 }
 0x130   : > { %v1269_v36 = vsel %vm1257_vm7, %v1252_v10, %v928_v60 }
 0x131   : > { %v2196_v53 = vpop.permute.xlu1 %2195 }
 0x132   : > { %v2492_v43 = vsel %vm1274_vm8, %v2476_v21, %v2196_v53 }
 0x133   : > { %v2142_v47 = vpop.permute.xlu0 %2141 }
 0x134   : > { %v2478_v61 = vsel %vm1257_vm7, %v2462_v28, %v2142_v47 }
 0x135   : > { %v1118_v34 = vpop.permute.xlu1 %1117 }
 0x136   : > { %v1301_v38 = vsel %vm1291_vm9, %v1284_v25, %v1118_v34 }
 0x137   : > { %v984_v18 = vpop.permute.xlu0 %983 }
 0x138   : > { %v1286_v49 = vsel %vm1274_vm8, %v1269_v36, %v984_v18 }
 0x139   : > { %v2332_v24 = vpop.permute.xlu1 %2331 }
 0x13a   : > { %v2508_v54 = vsel %vm1291_vm9, %v2492_v43, %v2332_v24 }
 0x13b   : > { %v2198_v56 = vpop.permute.xlu0 %2197 }
 0x13c   : > { %v2494_v51 = vsel %vm1274_vm8, %v2478_v61, %v2198_v56 }
 0x13d   : > { %v1182_v7 = vpop.permute.xlu1 %1181 }
 0x13e   : > { %v1318_v14 = vsel %vm1308_vm10, %v1301_v38, %v1182_v7 }
 0x13f   : > { %3333 = vmatprep.mubr.msk.bf16.mxu0 %vm1345_vm11, %v1318_v14  ;;  %v1120_v50 = vpop.permute.xlu0 %1119 }
 0x140   : > { %v1303_v29 = vsel %vm1291_vm9, %v1286_v49, %v1120_v50 }
 0x141   : > { %v2396_v4 = vpop.permute.xlu1 %2395 }
 0x142   : > { %v2524_v63 = vsel %vm1308_vm10, %v2508_v54, %v2396_v4 }
 0x143   : > { %3355 = vmatprep.mubr.msk.bf16.mxu1 %vm1345_vm11, %v2524_v63  ;;  %v2334_v1 = vpop.permute.xlu0 %2333 }
 0x144   : > { %v2510_v2 = vsel %vm1291_vm9, %v2494_v51, %v2334_v1 }
 0x145   : > { %v1184_v13 = vpop.permute.xlu1 %1183 }
 0x146   : > { %v1320_v11 = vsel %vm1308_vm10, %v1303_v29, %v1184_v13 }
 0x147   : > { %3334 = vmatmul.mubr.msk.bf16.gmra.mrb[8].mxu0 %vm1345_vm11, %v1320_v11  ;;  %v609_v9 = vpop.permute.xlu0 %608 }
 0x148   : > { %v1203_v24 = vsel %vm1189_vm3, %v4374_v40, %v609_v9 }
 0x149   : > { %v2398_v23 = vpop.permute.xlu1 %2397 }
 0x14a   : > { %v2526_v12 = vsel %vm1308_vm10, %v2510_v2, %v2398_v23 }
 0x14b   : > { %3356 = vmatmul.mubr.msk.bf16.gmra.mrb[8].mxu1 %vm1345_vm11, %v2526_v12  ;;  %v1824_v44 = vpop.permute.xlu0 %1823  ;;  %v4844_v12 = vld [vmem:[%s4990_s2] ss:$0 sm:$0xff] }
 0x14c   : > { %v2416_v25 = vsel %vm1189_vm3, %v4398_v52, %v1824_v44 }
 0x14d   : > { %v674_v26 = vpop.permute.xlu1 %673 }
 0x14e   : > { %v1220_v3 = vsel %vm1206_vm4, %v1203_v24, %v674_v26  ;;  %v1481_v26 = vld [vmem:[%s4839_s24 + $0x10] sm:$0xff] }
 0x14f   : > { %v611_v17 = vpop.permute.xlu0 %610 }
 0x150   : > { %v1205_v10 = vsel %vm1189_vm3, %v4438_v39, %v611_v17 }
 0x151   : > { %v1888_v15 = vpop.permute.xlu1 %1887 }
 0x152   : > { %v2432_v7 = vsel %vm1206_vm4, %v2416_v25, %v1888_v15 }
 0x153   : > { %v1826_v30 = vpop.permute.xlu0 %1825 }
 0x154   : > { %v2418_v21 = vsel %vm1189_vm3, %v4463_v62, %v1826_v30  ;;  %v1479_v30 = vld [vmem:[%s4839_s24] sm:$0xff] }
 0x155   : > { %v730_v22 = vpop.permute.xlu1 %729 }
 0x156   : > { %v1237_v27 = vsel %vm1223_vm5, %v1220_v3, %v730_v22 }
 0x157   : > { %v676_v20 = vpop.permute.xlu0 %675 }
 0x158   : > { %v1222_v36 = vsel %vm1206_vm4, %v1205_v10, %v676_v20  ;;  %v1483_v10 = vld [vmem:[%s4839_s24 + $0x20] sm:$0xff] }
 0x159   : > { %v1944_v31 = vpop.permute.xlu1 %1943 }
 0x15a   : > { %v2448_v40 = vsel %vm1223_vm5, %v2432_v7, %v1944_v31  ;;  %v1482_v31 = vld [vmem:[%s4839_s24 + $0x18] sm:$0xff] }
 0x15b   : > { %v1890_v55 = vpop.permute.xlu0 %1889 }
 0x15c   : > { %v2434_v52 = vsel %vm1206_vm4, %v2418_v21, %v1890_v55 }
 0x15d   : > { %v866_v41 = vpop.permute.xlu1 %865 }
 0x15e   : > { %v1254_v48 = vsel %vm1240_vm6, %v1237_v27, %v866_v41  ;;  %v3264_v27 = vld [vmem:[%s4839_s24 + $0x98] sm:$0xff] }
 0x15f   : > { %v732_v5 = vpop.permute.xlu0 %731 }
 0x160   : > { %v1239_v49 = vsel %vm1223_vm5, %v1222_v36, %v732_v5 }
 0x161   : > { %v2080_v6 = vpop.permute.xlu1 %2079 }
 0x162   : > { %v2464_v50 = vsel %vm1240_vm6, %v2448_v40, %v2080_v6  ;;  %v1480_v6 = vld [vmem:[%s4839_s24 + $0x8] sm:$0xff] }
 0x163   : > { %v1946_v32 = vpop.permute.xlu0 %1945 }
 0x164   : > { %v2450_v54 = vsel %vm1223_vm5, %v2434_v52, %v1946_v32 }
 0x165   : > { %v930_v59 = vpop.permute.xlu1 %929 }
 0x166   : > { %v1271_v19 = vsel %vm1257_vm7, %v1254_v48, %v930_v59 }
 0x167   : > { %v868_v60 = vpop.permute.xlu0 %867 }
 0x168   : > { %v1256_v39 = vsel %vm1240_vm6, %v1239_v49, %v868_v60  ;;  %v1484_v49 = vld [vmem:[%s4839_s24 + $0x28] sm:$0xff] }
 0x169   : > { %v2144_v53 = vpop.permute.xlu1 %2143 }
 0x16a   : > { %v2480_v43 = vsel %vm1257_vm7, %v2464_v50, %v2144_v53  ;;  %v3263_v53 = vld [vmem:[%s4839_s24 + $0x90] sm:$0xff] }
 0x16b   : > { %v2082_v47 = vpop.permute.xlu0 %2081 }
 0x16c   : > { %v2466_v62 = vsel %vm1240_vm6, %v2450_v54, %v2082_v47 }
 0x16d   : > { %v986_v34 = vpop.permute.xlu1 %985 }
 0x16e   : > { %v1288_v8 = vsel %vm1274_vm8, %v1271_v19, %v986_v34 }
 0x16f   : > { %v932_v16 = vpop.permute.xlu0 %931 }
 0x170   : > { %v1273_v28 = vsel %vm1257_vm7, %v1256_v39, %v932_v16 }
 0x171   : > { %v2200_v18 = vpop.permute.xlu1 %2199 }
 0x172   : > { %v2496_v4 = vsel %vm1274_vm8, %v2480_v43, %v2200_v18 }
 0x173   : > { %v2146_v33 = vpop.permute.xlu0 %2145 }
 0x174   : > { %v2482_v1 = vsel %vm1257_vm7, %v2466_v62, %v2146_v33  ;;  %v3261_v33 = vld [vmem:[%s4839_s24 + $0x80] sm:$0xff] }
 0x175   : > { %v1122_v57 = vpop.permute.xlu1 %1121 }
 0x176   : > { %v1305_v14 = vsel %vm1291_vm9, %v1288_v8, %v1122_v57 }
 0x177   : > { %v988_v0 = vpop.permute.xlu0 %987 }
 0x178   : > { %v1290_v61 = vsel %vm1274_vm8, %v1273_v28, %v988_v0 }
 0x179   : > { %v2336_v56 = vpop.permute.xlu1 %2335 }
 0x17a   : > { %v2512_v63 = vsel %vm1291_vm9, %v2496_v4, %v2336_v56 }
 0x17b   : > { %v2202_v38 = vpop.permute.xlu0 %2201 }
 0x17c   : > { %v2498_v37 = vsel %vm1274_vm8, %v2482_v1, %v2202_v38  ;;  %v3262_v38 = vld [vmem:[%s4839_s24 + $0x88] sm:$0xff] }
 0x17d   : > { %v1186_v42 = vpop.permute.xlu1 %1185 }
 0x17e   : > { %v1322_v35 = vsel %vm1308_vm10, %v1305_v14, %v1186_v42 }
 0x17f   : > { %3337 = vmatprep.mubr.msk.bf16.mxu0 %vm1345_vm11, %v1322_v35  ;;  %v1124_v58 = vpop.permute.xlu0 %1123 }
 0x180   : > { %v1307_v51 = vsel %vm1291_vm9, %v1290_v61, %v1124_v58  ;;  %v1485_v58 = vld [vmem:[%s4839_s24 + $0x30] sm:$0xff] }
 0x181   : > { %v2400_v45 = vpop.permute.xlu1 %2399 }
 0x182   : > { %v2528_v46 = vsel %vm1308_vm10, %v2512_v63, %v2400_v45  ;;  %v1486_v45 = vld [vmem:[%s4839_s24 + $0x38] sm:$0xff] }
 0x183   : > { %3359 = vmatprep.mubr.msk.bf16.mxu1 %vm1345_vm11, %v2528_v46  ;;  %v2338_v29 = vpop.permute.xlu0 %2337 }
 0x184   : > { %v2514_v13 = vsel %vm1291_vm9, %v2498_v37, %v2338_v29 }
 0x185   : > { %v2402_v11 = vpop.permute.xlu1 %2401 }
 0x186   : > { %v2530_v9 = vsel %vm1308_vm10, %v2514_v13, %v2402_v11  ;;  %v3267_v13 = vld [vmem:[%s4839_s24 + $0xb0] sm:$0xff] }
 0x187   : > { %3360 = vmatmul.mubr.msk.bf16.gmra.mrb[12].mxu1 %vm1345_vm11, %v2530_v9  ;;  %v1188_v2 = vpop.permute.xlu0 %1187 }
 0x188   : > { %v1324_v23 = vsel %vm1308_vm10, %v1307_v51, %v1188_v2  ;;  %v3265_v51 = vld [vmem:[%s4839_s24 + $0xa0] sm:$0xff] }
 0x189   : > { %3338 = vmatmul.mubr.msk.bf16.gmra.mrb[12].mxu0 %vm1345_vm11, %v1324_v23 }
 0x19a   : > { %v3327_v44 = vpop.f32.mrb[0].mxu0 }
 0x19b   : > { %v1465_v17 = vadd.f32 %v3327_v44, %v4844_v12  ;;  %v1400_v15 = vpop.f32.mrb[1].mxu0 }
 0x19c   : > { %v1463_v22 = vadd.f32 %v4844_v12, %v1400_v15  ;;  %v3328_v20 = vpop.f32.mrb[2].mxu0 }
 0x19d   : > { %v1497_v55 = vadd.f32 %v1481_v26, %v1465_v17  ;;  %v1466_v41 = vadd.f32 %v3328_v20, %v4844_v12  ;;  %v1403_v5 = vpop.f32.mrb[3].mxu0  ;;  %v3268_v17 = vld [vmem:[%s4839_s24 + $0xb8] sm:$0xff] }
 0x19e   : > { %v1495_v32 = vadd.f32 %v1479_v30, %v1463_v22  ;;  %v1464_v59 = vadd.f32 %v4844_v12, %v1403_v5  ;;  %v3349_v60 = vpop.f32.mrb[0].mxu1 }
 0x19f   : > { %v1513_v47 = vmax.f32 %v1497_v55, 0.0  ;;  %v1498_v34 = vadd.f32 %v1482_v31, %v1466_v41  ;;  %v2669_v16 = vadd.f32 %v3349_v60, %v4844_v12  ;;  %v2604_v18 = vpop.f32.mrb[1].mxu1  ;;  %v3266_v31 = vld [vmem:[%s4839_s24 + $0xa8] sm:$0xff] }
 0x1a0   : > { %v1511_v57 = vmax.f32 %v1495_v32, 0.0  ;;  %v1496_v24 = vadd.f32 %v1480_v6, %v1464_v59  ;;  %v2667_v0 = vadd.f32 %v4844_v12, %v2604_v18  ;;  %v3350_v3 = vpop.f32.mrb[2].mxu1 }
 0x1a1   : > { %1529 = vst.msk [vmem:[%s4856_s28 + $0x10] sm:$0xff] %vm1206_vm4, %v1513_v47  ;;  %v1514_v56 = vmax.f32 %v1498_v34, 0.0  ;;  %v2702_v48 = vadd.f32 %v3263_v53, %v2669_v16  ;;  %v2670_v25 = vadd.f32 %v3350_v3, %v4844_v12  ;;  %v2607_v19 = vpop.f32.mrb[3].mxu1  ;;  %v1489_v16 = vld [vmem:[%s4839_s24 + $0x50] sm:$0xff]  ;;  %v1490_v3 = vld [vmem:[%s4839_s24 + $0x58] sm:$0xff] }
 0x1a2   : > { %1527 = vst.msk [vmem:[%s4856_s28] sm:$0xff] %vm1206_vm4, %v1511_v57  ;;  %v1512_v7 = vmax.f32 %v1496_v24, 0.0  ;;  %v2700_v8 = vadd.f32 %v3261_v33, %v2667_v0  ;;  %v2668_v40 = vadd.f32 %v4844_v12, %v2607_v19  ;;  %v1487_v57 = vld [vmem:[%s4839_s24 + $0x40] sm:$0xff] }
 0x1a3   : > { %1530 = vst.msk [vmem:[%s4856_s28 + $0x18] sm:$0xff] %vm1206_vm4, %v1514_v56  ;;  %v2718_v14 = vmax.f32 %v2702_v48, 0.0  ;;  %v2703_v42 = vadd.f32 %v3264_v27, %v2670_v25  ;;  %v1488_v25 = vld [vmem:[%s4839_s24 + $0x48] sm:$0xff] }
 0x1a4   : > { %1528 = vst.msk [vmem:[%s4856_s28 + $0x8] sm:$0xff] %vm1206_vm4, %v1512_v7  ;;  %v2716_v21 = vmax.f32 %v2700_v8, 0.0  ;;  %v2701_v50 = vadd.f32 %v3262_v38, %v2668_v40  ;;  %v3271_v8 = vld [vmem:[%s4839_s24 + $0xd0] sm:$0xff] }
 0x1a5   : > { %3279 = vst.msk [vmem:[%s4856_s28 + $0x90] sm:$0xff] %vm1206_vm4, %v2718_v14  ;;  %v2719_v35 = vmax.f32 %v2703_v42, 0.0 }
 0x1a6   : > { %3277 = vst.msk [vmem:[%s4856_s28 + $0x80] sm:$0xff] %vm1206_vm4, %v2716_v21  ;;  %v2717_v52 = vmax.f32 %v2701_v50, 0.0  ;;  %v3269_v50 = vld [vmem:[%s4839_s24 + $0xc0] sm:$0xff] }
 0x1a7   : > { %3280 = vst.msk [vmem:[%s4856_s28 + $0x98] sm:$0xff] %vm1206_vm4, %v2719_v35 }
 0x1a8   : > { %3278 = vst.msk [vmem:[%s4856_s28 + $0x88] sm:$0xff] %vm1206_vm4, %v2717_v52 }
 0x1da   : > { %v3331_v43 = vpop.f32.mrb[4].mxu0 }
 0x1db   : > { %v1469_v54 = vadd.f32 %v3331_v43, %v4844_v12  ;;  %v1416_v4 = vpop.f32.mrb[5].mxu0 }
 0x1dc   : > { %v1467_v62 = vadd.f32 %v4844_v12, %v1416_v4  ;;  %v3332_v63 = vpop.f32.mrb[6].mxu0 }
 0x1dd   : > { %v1501_v36 = vadd.f32 %v1485_v58, %v1469_v54  ;;  %v1470_v1 = vadd.f32 %v3332_v63, %v4844_v12  ;;  %v1419_v46 = vpop.f32.mrb[7].mxu0  ;;  %v3272_v54 = vld [vmem:[%s4839_s24 + $0xd8] sm:$0xff] }
 0x1de   : > { %v1499_v37 = vadd.f32 %v1483_v10, %v1467_v62  ;;  %v1468_v29 = vadd.f32 %v4844_v12, %v1419_v46  ;;  %v3353_v39 = vpop.f32.mrb[4].mxu1 }
 0x1df   : > { %v1517_v28 = vmax.f32 %v1501_v36, 0.0  ;;  %v1502_v11 = vadd.f32 %v1486_v45, %v1470_v1  ;;  %v2673_v61 = vadd.f32 %v3353_v39, %v4844_v12  ;;  %v2620_v9 = vpop.f32.mrb[5].mxu1  ;;  %v3270_v45 = vld [vmem:[%s4839_s24 + $0xc8] sm:$0xff] }
 0x1e0   : > { %v1515_v2 = vmax.f32 %v1499_v37, 0.0  ;;  %v1500_v23 = vadd.f32 %v1484_v49, %v1468_v29  ;;  %v2671_v44 = vadd.f32 %v4844_v12, %v2620_v9  ;;  %v3354_v26 = vpop.f32.mrb[6].mxu1 }
 0x1e1   : > { %1533 = vst.msk [vmem:[%s4856_s28 + $0x30] sm:$0xff] %vm1206_vm4, %v1517_v28  ;;  %v1518_v15 = vmax.f32 %v1502_v11, 0.0  ;;  %v2706_v30 = vadd.f32 %v3267_v13, %v2673_v61  ;;  %v2674_v22 = vadd.f32 %v3354_v26, %v4844_v12  ;;  %v2623_v20 = vpop.f32.mrb[7].mxu1  ;;  %v3275_v61 = vld [vmem:[%s4839_s24 + $0xf0] sm:$0xff]  ;;  %v3276_v26 = vld [vmem:[%s4839_s24 + $0xf8] sm:$0xff] }
 0x1e2   : > { %1531 = vst.msk [vmem:[%s4856_s28 + $0x20] sm:$0xff] %vm1206_vm4, %v1515_v2  ;;  %v1516_v55 = vmax.f32 %v1500_v23, 0.0  ;;  %v2704_v41 = vadd.f32 %v3265_v51, %v2671_v44  ;;  %v2672_v5 = vadd.f32 %v4844_v12, %v2623_v20  ;;  %v3273_v2 = vld [vmem:[%s4839_s24 + $0xe0] sm:$0xff] }
 0x1e3   : > { %1534 = vst.msk [vmem:[%s4856_s28 + $0x38] sm:$0xff] %vm1206_vm4, %v1518_v15  ;;  %v2722_v6 = vmax.f32 %v2706_v30, 0.0  ;;  %v2707_v32 = vadd.f32 %v3268_v17, %v2674_v22  ;;  %v1493_v15 = vld [vmem:[%s4839_s24 + $0x70] sm:$0xff] }
 0x1e4   : > { %1532 = vst.msk [vmem:[%s4856_s28 + $0x28] sm:$0xff] %vm1206_vm4, %v1516_v55  ;;  %v2720_v59 = vmax.f32 %v2704_v41, 0.0  ;;  %v2705_v60 = vadd.f32 %v3266_v31, %v2672_v5  ;;  %v3274_v55 = vld [vmem:[%s4839_s24 + $0xe8] sm:$0xff]  ;;  %v1491_v5 = vld [vmem:[%s4839_s24 + $0x60] sm:$0xff] }
 0x1e5   : > { %3283 = vst.msk [vmem:[%s4856_s28 + $0xb0] sm:$0xff] %vm1206_vm4, %v2722_v6  ;;  %v2723_v53 = vmax.f32 %v2707_v32, 0.0 }
 0x1e6   : > { %3281 = vst.msk [vmem:[%s4856_s28 + $0xa0] sm:$0xff] %vm1206_vm4, %v2720_v59  ;;  %v2721_v47 = vmax.f32 %v2705_v60, 0.0 }
 0x1e7   : > { %3284 = vst.msk [vmem:[%s4856_s28 + $0xb8] sm:$0xff] %vm1206_vm4, %v2723_v53  ;;  %v1494_v53 = vld [vmem:[%s4839_s24 + $0x78] sm:$0xff] }
 0x1e8   : > { %3282 = vst.msk [vmem:[%s4856_s28 + $0xa8] sm:$0xff] %vm1206_vm4, %v2721_v47 }
 0x21a   : > { %v3335_v34 = vpop.f32.mrb[8].mxu0 }
 0x21b   : > { %v1473_v18 = vadd.f32 %v3335_v34, %v4844_v12  ;;  %v1432_v33 = vpop.f32.mrb[9].mxu0 }
 0x21c   : > { %v1471_v24 = vadd.f32 %v4844_v12, %v1432_v33  ;;  %v3336_v0 = vpop.f32.mrb[10].mxu0 }
 0x21d   : > { %v1505_v27 = vadd.f32 %v1489_v16, %v1473_v18  ;;  %v1474_v56 = vadd.f32 %v3336_v0, %v4844_v12  ;;  %v1435_v48 = vpop.f32.mrb[11].mxu0 }
 0x21e   : > { %v1503_v19 = vadd.f32 %v1487_v57, %v1471_v24  ;;  %v1472_v38 = vadd.f32 %v4844_v12, %v1435_v48  ;;  %v3357_v7 = vpop.f32.mrb[8].mxu1  ;;  %v1492_v57 = vld [vmem:[%s4839_s24 + $0x68] sm:$0xff] }
 0x21f   : > { %v1521_v40 = vmax.f32 %v1505_v27, 0.0  ;;  %v1506_v14 = vadd.f32 %v1490_v3, %v1474_v56  ;;  %v2677_v42 = vadd.f32 %v3357_v7, %v4844_v12  ;;  %v2636_v21 = vpop.f32.mrb[9].mxu1 }
 0x220   : > { %v1519_v35 = vmax.f32 %v1503_v19, 0.0  ;;  %v1504_v52 = vadd.f32 %v1488_v25, %v1472_v38  ;;  %v2675_v43 = vadd.f32 %v4844_v12, %v2636_v21  ;;  %v3358_v58 = vpop.f32.mrb[10].mxu1 }
 0x221   : > { %1537 = vst.msk [vmem:[%s4856_s28 + $0x50] sm:$0xff] %vm1206_vm4, %v1521_v40  ;;  %v1522_v4 = vmax.f32 %v1506_v14, 0.0  ;;  %v2710_v10 = vadd.f32 %v3271_v8, %v2677_v42  ;;  %v2678_v62 = vadd.f32 %v3358_v58, %v4844_v12  ;;  %v2639_v63 = vpop.f32.mrb[11].mxu1 }
 0x222   : > { %1535 = vst.msk [vmem:[%s4856_s28 + $0x40] sm:$0xff] %vm1206_vm4, %v1519_v35  ;;  %v1520_v36 = vmax.f32 %v1504_v52, 0.0  ;;  %v2708_v1 = vadd.f32 %v3269_v50, %v2675_v43  ;;  %v2676_v46 = vadd.f32 %v4844_v12, %v2639_v63 }
 0x223   : > { %1538 = vst.msk [vmem:[%s4856_s28 + $0x58] sm:$0xff] %vm1206_vm4, %v1522_v4  ;;  %v2726_v49 = vmax.f32 %v2710_v10, 0.0  ;;  %v2711_v37 = vadd.f32 %v3272_v54, %v2678_v62 }
 0x224   : > { %1536 = vst.msk [vmem:[%s4856_s28 + $0x48] sm:$0xff] %vm1206_vm4, %v1520_v36  ;;  %v2724_v29 = vmax.f32 %v2708_v1, 0.0  ;;  %v2709_v39 = vadd.f32 %v3270_v45, %v2676_v46 }
 0x225   : > { %3287 = vst.msk [vmem:[%s4856_s28 + $0xd0] sm:$0xff] %vm1206_vm4, %v2726_v49  ;;  %v2727_v13 = vmax.f32 %v2711_v37, 0.0 }
 0x226   : > { %3285 = vst.msk [vmem:[%s4856_s28 + $0xc0] sm:$0xff] %vm1206_vm4, %v2724_v29  ;;  %v2725_v28 = vmax.f32 %v2709_v39, 0.0 }
 0x227   : > { %3288 = vst.msk [vmem:[%s4856_s28 + $0xd8] sm:$0xff] %vm1206_vm4, %v2727_v13 }
 0x228   : > { %3286 = vst.msk [vmem:[%s4856_s28 + $0xc8] sm:$0xff] %vm1206_vm4, %v2725_v28 }
 0x25a   : > { %v3361_v11 = vpop.f32.mrb[12].mxu1 }
 0x25b   : > { %v2681_v9 = vadd.f32 %v3361_v11, %v4844_v12  ;;  %v2652_v51 = vpop.f32.mrb[13].mxu1 }
 0x25c   : > { %v2679_v23 = vadd.f32 %v4844_v12, %v2652_v51  ;;  %v3362_v44 = vpop.f32.mrb[14].mxu1  ;;  %v3339_v17 = vpop.f32.mrb[12].mxu0 }
 0x25d   : > { %v2714_v30 = vadd.f32 %v3275_v61, %v2681_v9  ;;  %v2682_v22 = vadd.f32 %v3362_v44, %v4844_v12  ;;  %v1477_v20 = vadd.f32 %v3339_v17, %v4844_v12  ;;  %v2655_v31 = vpop.f32.mrb[15].mxu1  ;;  %v1448_v41 = vpop.f32.mrb[13].mxu0 }
 0x25e   : > { %v2712_v6 = vadd.f32 %v3273_v2, %v2679_v23  ;;  %v2680_v32 = vadd.f32 %v4844_v12, %v2655_v31  ;;  %v1475_v59 = vadd.f32 %v4844_v12, %v1448_v41  ;;  %v3340_v60 = vpop.f32.mrb[14].mxu0 }
 0x25f   : > { %v2730_v47 = vmax.f32 %v2714_v30, 0.0  ;;  %v2715_v34 = vadd.f32 %v3276_v26, %v2682_v22  ;;  %v1509_v16 = vadd.f32 %v1493_v15, %v1477_v20  ;;  %v1478_v18 = vadd.f32 %v3340_v60, %v4844_v12  ;;  %v1451_v33 = vpop.f32.mrb[15].mxu0 }
 0x260   : > { %v2728_v24 = vmax.f32 %v2712_v6, 0.0  ;;  %v2713_v0 = vadd.f32 %v3274_v55, %v2680_v32  ;;  %v1507_v3 = vadd.f32 %v1491_v5, %v1475_v59  ;;  %v1476_v27 = vadd.f32 %v4844_v12, %v1451_v33 }
 0x261   : > { %3291 = vst.msk [vmem:[%s4856_s28 + $0xf0] sm:$0xff] %vm1206_vm4, %v2730_v47  ;;  %v2731_v56 = vmax.f32 %v2715_v34, 0.0  ;;  %v1525_v48 = vmax.f32 %v1509_v16, 0.0  ;;  %v1510_v25 = vadd.f32 %v1494_v53, %v1478_v18 }
 0x262   : > { %3289 = vst.msk [vmem:[%s4856_s28 + $0xe0] sm:$0xff] %vm1206_vm4, %v2728_v24  ;;  %v2729_v19 = vmax.f32 %v2713_v0, 0.0  ;;  %v1523_v38 = vmax.f32 %v1507_v3, 0.0  ;;  %v1508_v7 = vadd.f32 %v1492_v57, %v1476_v27 }
 0x263   : > { %3292 = vst.msk [vmem:[%s4856_s28 + $0xf8] sm:$0xff] %vm1206_vm4, %v2731_v56  ;;  %1541 = vst.msk [vmem:[%s4856_s28 + $0x70] sm:$0xff] %vm1206_vm4, %v1525_v48  ;;  %v1526_v8 = vmax.f32 %v1510_v25, 0.0 }
 0x264   : > { %3290 = vst.msk [vmem:[%s4856_s28 + $0xe8] sm:$0xff] %vm1206_vm4, %v2729_v19  ;;  %1539 = vst.msk [vmem:[%s4856_s28 + $0x60] sm:$0xff] %vm1206_vm4, %v1523_v38  ;;  %v1524_v12 = vmax.f32 %v1508_v7, 0.0 }
 0x265   : > { %1542 = vst.msk [vmem:[%s4856_s28 + $0x78] sm:$0xff] %vm1206_vm4, %v1526_v8 }
 0x266   : > { %1540 = vst.msk [vmem:[%s4856_s28 + $0x68] sm:$0xff] %vm1206_vm4, %v1524_v12 }
 0x267 PF: > { %s14_s17 = sadd.s32 1, %s3570_s17   ;;  %s4993_s15 = smov %s3566_s16 }
 0x268   : > { %p11_p5 = scmp.ge.s32.totalorder %s14_s17, 4   ;;  %s4994_s16 = smov %s4996_s18 }
 0x26a   :  { %13 = sbr.rel (!%p11_p5) target bundleno = 2 (0x2), region = 83 }

</bundles_post_ra>
